<compile_context>
chip_gen: v7x
topology: tpu7x:2x2x1
jax: 0.10.0
libtpu: 0.0.40
codegen_flags: <defaults>
</compile_context>

<pallas_src>
import jax
import jax.numpy as jnp
from jax.experimental import pallas as pl
from jax.experimental.pallas import tpu as pltpu

# Logical (PyTorch) sizes.
SUB_SAMPLING_SIZE = 100   # input features
HIDDEN = 400
LATENT = 20
ORIGINAL_SIZE = 784       # output features

# Lane-padded sizes (multiples of 128).
D_IN_PAD = 128
HID_PAD = 512
LAT_PAD = 128
HEAD_PAD = 2 * LAT_PAD    # fused [mu | logvar] head, each half 128-aligned
OUT_PAD = 896


def vae_kernel(x_ref, eps_ref,
               w1_ref, b1_ref,
               wh_ref, bh_ref,
               w3_ref, b3_ref,
               w4_ref, b4_ref,
               recon_ref, enc_ref):
    # ---- encode: fc1 + relu (bf16 activations carried between matmuls) ----
    h1 = jnp.dot(x_ref[...], w1_ref[...],
                 preferred_element_type=jnp.float32) + b1_ref[...]        # [TM, 512] f32
    h1 = jnp.maximum(h1, 0.0).astype(jnp.bfloat16)                        # [TM, 512] bf16

    # ---- fused fc21/fc22 head: one MXU pass; mu/logvar are 128-lane halves ----
    enc = jnp.dot(h1, wh_ref[...],
                  preferred_element_type=jnp.float32) + bh_ref[...]       # [TM, 256] f32
    enc_ref[...] = enc                                                    # single fused store
    mu = enc[:, :LAT_PAD]                                                 # [TM, 128]
    logvar = enc[:, LAT_PAD:]                                             # [TM, 128]

    # ---- reparameterize (eps pre-sampled bf16, zero-padded past LATENT) ----
    z = mu + eps_ref[...].astype(jnp.float32) * jnp.exp(0.5 * logvar)     # [TM, 128] f32

    # ---- decode: fc3 + relu, fc4 + sigmoid ----
    h3 = jnp.dot(z.astype(jnp.bfloat16), w3_ref[...],
                 preferred_element_type=jnp.float32) + b3_ref[...]
    h3 = jnp.maximum(h3, 0.0).astype(jnp.bfloat16)                        # [TM, 512] bf16
    logits = jnp.dot(h3, w4_ref[...],
                     preferred_element_type=jnp.float32) + b4_ref[...]    # [TM, 896] f32

    recon_ref[...] = jax.nn.sigmoid(logits).astype(jnp.bfloat16)          # bf16 writeback


def _pad2d(a, rows, cols):
    return jnp.pad(a, ((0, rows - a.shape[0]), (0, cols - a.shape[1])))


def pack_params(p):
    """Pad weights to lane-aligned shapes, fuse fc21/fc22 into one head weight,
    cast weights to bf16 (biases stay f32). Done once, outside the kernel."""
    w1 = _pad2d(p["w1"], D_IN_PAD, HID_PAD).astype(jnp.bfloat16)          # [128, 512]
    b1 = _pad2d(p["b1"], 1, HID_PAD)                                      # [1, 512]

    wh = jnp.zeros((HID_PAD, HEAD_PAD), jnp.float32)
    wh = wh.at[:HIDDEN, :LATENT].set(p["w21"])
    wh = wh.at[:HIDDEN, LAT_PAD:LAT_PAD + LATENT].set(p["w22"])
    wh = wh.astype(jnp.bfloat16)                                          # [512, 256]
    bh = jnp.zeros((1, HEAD_PAD), jnp.float32)
    bh = bh.at[:, :LATENT].set(p["b21"])
    bh = bh.at[:, LAT_PAD:LAT_PAD + LATENT].set(p["b22"])                 # [1, 256]

    w3 = _pad2d(p["w3"], LAT_PAD, HID_PAD).astype(jnp.bfloat16)           # [128, 512]
    b3 = _pad2d(p["b3"], 1, HID_PAD)                                      # [1, 512]
    w4 = _pad2d(p["w4"], HID_PAD, OUT_PAD).astype(jnp.bfloat16)           # [512, 896]
    b4 = _pad2d(p["b4"], 1, OUT_PAD)                                      # [1, 896]
    return (w1, b1, wh, bh, w3, b3, w4, b4)


def _pick_tm(B):
    """Batch tile. Small batches: round up to 8. Large batches: 128..512-row
    tiles, chosen so the grid has >=2 steps whenever B permits (v7x megacore)."""
    if B <= 128:
        return max(8, -(-B // 8) * 8)
    tm = (B // 2) // 128 * 128
    return int(min(512, max(128, tm)))


@jax.jit
def vae_forward(x, eps, packed):
    """x: [..., 100] f32 (reshaped to [-1, 100] like the torch module),
       eps: [B, 20] f32, packed: output of pack_params."""
    x = x.reshape(-1, SUB_SAMPLING_SIZE)
    B = x.shape[0]

    TM = _pick_tm(B)
    B_pad = -(-B // TM) * TM

    # Pad + cast to bf16 in one pass (halves input-side HBM traffic).
    x_p = jnp.pad(x.astype(jnp.bfloat16),
                  ((0, B_pad - B), (0, D_IN_PAD - SUB_SAMPLING_SIZE)))
    eps_p = jnp.pad(eps.astype(jnp.bfloat16),
                    ((0, B_pad - B), (0, LAT_PAD - LATENT)))

    w1, b1, wh, bh, w3, b3, w4, b4 = packed

    def row_spec(cols):
        return pl.BlockSpec((TM, cols), lambda i: (i, 0))

    def whole(a):
        return pl.BlockSpec(a.shape, lambda i: (0, 0))

    flops = 2 * B_pad * (D_IN_PAD * HID_PAD + HID_PAD * HEAD_PAD
                         + LAT_PAD * HID_PAD + HID_PAD * OUT_PAD)
    transcendentals = B_pad * (LAT_PAD + OUT_PAD)
    weight_bytes = sum(int(a.size) * a.dtype.itemsize for a in packed)
    io_bytes = ((int(x_p.size) + int(eps_p.size)) * 2          # bf16 inputs
                + B_pad * (OUT_PAD * 2 + HEAD_PAD * 4))        # bf16 recon + f32 enc

    recon_p, enc_p = pl.pallas_call(
        vae_kernel,
        out_shape=(
            jax.ShapeDtypeStruct((B_pad, OUT_PAD), jnp.bfloat16),
            jax.ShapeDtypeStruct((B_pad, HEAD_PAD), jnp.float32),
        ),
        grid=(B_pad // TM,),
        in_specs=[row_spec(D_IN_PAD), row_spec(LAT_PAD),
                  whole(w1), whole(b1), whole(wh), whole(bh),
                  whole(w3), whole(b3), whole(w4), whole(b4)],
        out_specs=(row_spec(OUT_PAD), row_spec(HEAD_PAD)),
        compiler_params=pltpu.CompilerParams(
            dimension_semantics=("parallel",)),
        cost_estimate=pl.CostEstimate(flops=flops,
                                      transcendentals=transcendentals,
                                      bytes_accessed=weight_bytes + io_bytes),
    )(x_p, eps_p, w1, b1, wh, bh, w3, b3, w4, b4)

    recon = recon_p[:B, :ORIGINAL_SIZE].astype(jnp.float32)
    mu = enc_p[:B, :LATENT]
    logvar = enc_p[:B, LAT_PAD:LAT_PAD + LATENT]
    return recon, mu, logvar


def init_params(key):
    """Deterministic PyTorch-style (uniform +-1/sqrt(fan_in)) init.
    Weights stored transposed as [in, out]; biases as [1, out]."""
    def linear(key, fan_in, fan_out):
        kw, kb = jax.random.split(key)
        bound = 1.0 / jnp.sqrt(fan_in)
        w = jax.random.uniform(kw, (fan_in, fan_out), jnp.float32, -bound, bound)
        b = jax.random.uniform(kb, (1, fan_out), jnp.float32, -bound, bound)
        return w, b

    k1, k21, k22, k3, k4 = jax.random.split(key, 5)
    w1, b1 = linear(k1, SUB_SAMPLING_SIZE, HIDDEN)
    w21, b21 = linear(k21, HIDDEN, LATENT)
    w22, b22 = linear(k22, HIDDEN, LATENT)
    w3, b3 = linear(k3, LATENT, HIDDEN)
    w4, b4 = linear(k4, HIDDEN, ORIGINAL_SIZE)
    return dict(w1=w1, b1=b1, w21=w21, b21=b21, w22=w22, b22=b22,
                w3=w3, b3=b3, w4=w4, b4=b4)


def vae_ref(x, eps, p):
    """Pure-JAX reference using the same bf16-rounded weights as the kernel
    (f32 activations / f32 matmuls)."""
    q = lambda w: w.astype(jnp.bfloat16).astype(jnp.float32)
    h1 = jax.nn.relu(x @ q(p["w1"]) + p["b1"])
    mu = h1 @ q(p["w21"]) + p["b21"]
    logvar = h1 @ q(p["w22"]) + p["b22"]
    z = mu + eps * jnp.exp(0.5 * logvar)
    h3 = jax.nn.relu(z @ q(p["w3"]) + p["b3"])
    recon = jax.nn.sigmoid(h3 @ q(p["w4"]) + p["b4"])
    return recon, mu, logvar


def _check(B, k_x, k_eps, params, packed):
    x = jax.random.normal(k_x, (B, SUB_SAMPLING_SIZE), jnp.float32)
    eps = jax.random.normal(k_eps, (B, LATENT), jnp.float32)
    recon, mu, logvar = vae_forward(x, eps, packed)
    jax.block_until_ready((recon, mu, logvar))

    r_ref, mu_r, lv_r = vae_ref(x, eps, params)
    assert recon.shape == (B, ORIGINAL_SIZE)
    assert mu.shape == (B, LATENT) and logvar.shape == (B, LATENT)
    # Kernel runs bf16 activations (and bf16 recon store); reference is f32
    # activations over the same bf16-rounded weights -> loose-ish tolerances.
    assert bool(jnp.allclose(mu, mu_r, atol=3e-2)), "mu mismatch"
    assert bool(jnp.allclose(logvar, lv_r, atol=3e-2)), "logvar mismatch"
    assert bool(jnp.allclose(recon, r_ref, atol=3e-2)), "recon mismatch"


if __name__ == "__main__":
    key = jax.random.PRNGKey(0)
    k_params, k_x, k_eps, k_x2, k_eps2 = jax.random.split(key, 5)

    params = init_params(k_params)
    packed = pack_params(params)

    # module's forward does x.view(-1, sub_sampling_size); we feed [B, 100] directly.
    # eps is sampled outside the kernel (torch.randn_like equivalent), passed in.
    _check(8, k_x, k_eps, params, packed)          # small-batch path (TM=8, grid=1)
    _check(200, k_x2, k_eps2, params, packed)      # multi-tile path (TM=128, grid=2, row padding)

    print("KERNEL_OK")
</pallas_src>

<mosaic_0001>
module attributes {stable_mosaic.version = 11 : i64} {
  func.func @vae_kernel(%arg0: i32, %arg1: memref<8x128xbf16, #tpu.memory_space<vmem>>, %arg2: memref<8x128xbf16, #tpu.memory_space<vmem>>, %arg3: memref<128x512xbf16, #tpu.memory_space<vmem>>, %arg4: memref<1x512xf32, #tpu.memory_space<vmem>>, %arg5: memref<512x256xbf16, #tpu.memory_space<vmem>>, %arg6: memref<1x256xf32, #tpu.memory_space<vmem>>, %arg7: memref<128x512xbf16, #tpu.memory_space<vmem>>, %arg8: memref<1x512xf32, #tpu.memory_space<vmem>>, %arg9: memref<512x896xbf16, #tpu.memory_space<vmem>>, %arg10: memref<1x896xf32, #tpu.memory_space<vmem>>, %arg11: memref<8x896xbf16, #tpu.memory_space<vmem>>, %arg12: memref<8x256xf32, #tpu.memory_space<vmem>>) attributes {dimension_semantics = [#tpu.dimension_semantics<parallel>], iteration_bounds = array<i64: 1>, scalar_prefetch = 0 : i64, scratch_operands = 0 : i64, tpu.core_type = #tpu.core_type<tc>, window_params = [{transform_indices = @transform_0, window_bounds = array<i64: 8, 128>}, {transform_indices = @transform_1, window_bounds = array<i64: 8, 128>}, {pipeline_mode = #tpu.pipeline_mode<synchronous>, transform_indices = @transform_2, window_bounds = array<i64: 128, 512>}, {pipeline_mode = #tpu.pipeline_mode<synchronous>, transform_indices = @transform_3, window_bounds = array<i64: 1, 512>}, {pipeline_mode = #tpu.pipeline_mode<synchronous>, transform_indices = @transform_4, window_bounds = array<i64: 512, 256>}, {pipeline_mode = #tpu.pipeline_mode<synchronous>, transform_indices = @transform_5, window_bounds = array<i64: 1, 256>}, {pipeline_mode = #tpu.pipeline_mode<synchronous>, transform_indices = @transform_6, window_bounds = array<i64: 128, 512>}, {pipeline_mode = #tpu.pipeline_mode<synchronous>, transform_indices = @transform_7, window_bounds = array<i64: 1, 512>}, {pipeline_mode = #tpu.pipeline_mode<synchronous>, transform_indices = @transform_8, window_bounds = array<i64: 512, 896>}, {pipeline_mode = #tpu.pipeline_mode<synchronous>, transform_indices = @transform_9, window_bounds = array<i64: 1, 896>}, {transform_indices = @transform_10, window_bounds = array<i64: 8, 896>}, {transform_indices = @transform_11, window_bounds = array<i64: 8, 256>}]} {
    %c0 = arith.constant 0 : index
    %c0_0 = arith.constant 0 : index
    %0 = vector.load %arg1[%c0, %c0_0] : memref<8x128xbf16, #tpu.memory_space<vmem>>, vector<8x128xbf16>
    %c0_1 = arith.constant 0 : index
    %c0_2 = arith.constant 0 : index
    %1 = vector.load %arg3[%c0_1, %c0_2] : memref<128x512xbf16, #tpu.memory_space<vmem>>, vector<128x512xbf16>
    %cst = arith.constant dense<0.000000e+00> : vector<8x512xf32>
    %2 = tpu.matmul %0, %1, %cst {dimension_numbers = #tpu.dot_dimension_numbers<[1], [0], [0], [1], [0, 0, 1, 1], [], []>} : vector<8x128xbf16>, vector<128x512xbf16>, vector<8x512xf32> -> vector<8x512xf32>
    %c0_3 = arith.constant 0 : index
    %c0_4 = arith.constant 0 : index
    %3 = vector.load %arg4[%c0_3, %c0_4] : memref<1x512xf32, #tpu.memory_space<vmem>>, vector<1x512xf32>
    %4 = vector.broadcast %3 : vector<1x512xf32> to vector<8x512xf32>
    %5 = arith.addf %2, %4 : vector<8x512xf32>
    %cst_5 = arith.constant 0.000000e+00 : f32
    %6 = vector.broadcast %cst_5 : f32 to vector<8x512xf32>
    %7 = arith.maximumf %5, %6 : vector<8x512xf32>
    %8 = arith.truncf %7 : vector<8x512xf32> to vector<8x512xbf16>
    %c0_6 = arith.constant 0 : index
    %c0_7 = arith.constant 0 : index
    %9 = vector.load %arg5[%c0_6, %c0_7] : memref<512x256xbf16, #tpu.memory_space<vmem>>, vector<512x256xbf16>
    %cst_8 = arith.constant dense<0.000000e+00> : vector<8x256xf32>
    %10 = tpu.matmul %8, %9, %cst_8 {dimension_numbers = #tpu.dot_dimension_numbers<[1], [0], [0], [1], [0, 0, 1, 1], [], []>} : vector<8x512xbf16>, vector<512x256xbf16>, vector<8x256xf32> -> vector<8x256xf32>
    %c0_9 = arith.constant 0 : index
    %c0_10 = arith.constant 0 : index
    %11 = vector.load %arg6[%c0_9, %c0_10] : memref<1x256xf32, #tpu.memory_space<vmem>>, vector<1x256xf32>
    %12 = vector.broadcast %11 : vector<1x256xf32> to vector<8x256xf32>
    %13 = arith.addf %10, %12 : vector<8x256xf32>
    %c0_11 = arith.constant 0 : index
    %c0_12 = arith.constant 0 : index
    %14 = vector.load %arg12[%c0_11, %c0_12] : memref<8x256xf32, #tpu.memory_space<vmem>>, vector<8x256xf32>
    tpu.vector_store %arg12[%c0_11, %c0_12], %13 {strides = array<i32>} : memref<8x256xf32, #tpu.memory_space<vmem>>, vector<8x256xf32>,
    %15 = vector.extract_strided_slice %13 {offsets = [0, 0], sizes = [8, 128], strides = [1, 1]} : vector<8x256xf32> to vector<8x128xf32>
    %16 = vector.extract_strided_slice %13 {offsets = [0, 128], sizes = [8, 128], strides = [1, 1]} : vector<8x256xf32> to vector<8x128xf32>
    %c0_13 = arith.constant 0 : index
    %c0_14 = arith.constant 0 : index
    %17 = vector.load %arg2[%c0_13, %c0_14] : memref<8x128xbf16, #tpu.memory_space<vmem>>, vector<8x128xbf16>
    %18 = arith.extf %17 : vector<8x128xbf16> to vector<8x128xf32>
    %cst_15 = arith.constant 5.000000e-01 : f32
    %19 = vector.broadcast %cst_15 : f32 to vector<8x128xf32>
    %20 = arith.mulf %19, %16 : vector<8x128xf32>
    %21 = math.exp %20 : vector<8x128xf32>
    %22 = arith.mulf %18, %21 : vector<8x128xf32>
    %23 = arith.addf %15, %22 : vector<8x128xf32>
    %24 = arith.truncf %23 : vector<8x128xf32> to vector<8x128xbf16>
    %c0_16 = arith.constant 0 : index
    %c0_17 = arith.constant 0 : index
    %25 = vector.load %arg7[%c0_16, %c0_17] : memref<128x512xbf16, #tpu.memory_space<vmem>>, vector<128x512xbf16>
    %cst_18 = arith.constant dense<0.000000e+00> : vector<8x512xf32>
    %26 = tpu.matmul %24, %25, %cst_18 {dimension_numbers = #tpu.dot_dimension_numbers<[1], [0], [0], [1], [0, 0, 1, 1], [], []>} : vector<8x128xbf16>, vector<128x512xbf16>, vector<8x512xf32> -> vector<8x512xf32>
    %c0_19 = arith.constant 0 : index
    %c0_20 = arith.constant 0 : index
    %27 = vector.load %arg8[%c0_19, %c0_20] : memref<1x512xf32, #tpu.memory_space<vmem>>, vector<1x512xf32>
    %28 = vector.broadcast %27 : vector<1x512xf32> to vector<8x512xf32>
    %29 = arith.addf %26, %28 : vector<8x512xf32>
    %cst_21 = arith.constant 0.000000e+00 : f32
    %30 = vector.broadcast %cst_21 : f32 to vector<8x512xf32>
    %31 = arith.maximumf %29, %30 : vector<8x512xf32>
    %32 = arith.truncf %31 : vector<8x512xf32> to vector<8x512xbf16>
    %c0_22 = arith.constant 0 : index
    %c0_23 = arith.constant 0 : index
    %33 = vector.load %arg9[%c0_22, %c0_23] : memref<512x896xbf16, #tpu.memory_space<vmem>>, vector<512x896xbf16>
    %cst_24 = arith.constant dense<0.000000e+00> : vector<8x896xf32>
    %34 = tpu.matmul %32, %33, %cst_24 {dimension_numbers = #tpu.dot_dimension_numbers<[1], [0], [0], [1], [0, 0, 1, 1], [], []>} : vector<8x512xbf16>, vector<512x896xbf16>, vector<8x896xf32> -> vector<8x896xf32>
    %c0_25 = arith.constant 0 : index
    %c0_26 = arith.constant 0 : index
    %35 = vector.load %arg10[%c0_25, %c0_26] : memref<1x896xf32, #tpu.memory_space<vmem>>, vector<1x896xf32>
    %36 = vector.broadcast %35 : vector<1x896xf32> to vector<8x896xf32>
    %37 = arith.addf %34, %36 : vector<8x896xf32>
    %38 = arith.negf %37 : vector<8x896xf32>
    %39 = math.exp %38 : vector<8x896xf32>
    %cst_27 = arith.constant 1.000000e+00 : f32
    %40 = vector.broadcast %cst_27 : f32 to vector<8x896xf32>
    %41 = arith.addf %40, %39 : vector<8x896xf32>
    %42 = arith.divf %40, %41 : vector<8x896xf32>
    %43 = arith.truncf %42 : vector<8x896xf32> to vector<8x896xbf16>
    %c0_28 = arith.constant 0 : index
    %c0_29 = arith.constant 0 : index
    %44 = vector.load %arg11[%c0_28, %c0_29] : memref<8x896xbf16, #tpu.memory_space<vmem>>, vector<8x896xbf16>
    tpu.vector_store %arg11[%c0_28, %c0_29], %43 {strides = array<i32>} : memref<8x896xbf16, #tpu.memory_space<vmem>>, vector<8x896xbf16>,
    return
  }
  func.func @transform_0(%arg0: i32) -> (i32, i32) {
    %c0_i32 = arith.constant 0 : i32
    %c0_i32_0 = arith.constant 0 : i32
    return %arg0, %c0_i32 : i32, i32
  }
  func.func @transform_1(%arg0: i32) -> (i32, i32) {
    %c0_i32 = arith.constant 0 : i32
    %c0_i32_0 = arith.constant 0 : i32
    return %arg0, %c0_i32 : i32, i32
  }
  func.func @transform_2(%arg0: i32) -> (i32, i32) {
    %c0_i32 = arith.constant 0 : i32
    %c0_i32_0 = arith.constant 0 : i32
    %c0_i32_1 = arith.constant 0 : i32
    return %c0_i32, %c0_i32_0 : i32, i32
  }
  func.func @transform_3(%arg0: i32) -> (i32, i32) {
    %c0_i32 = arith.constant 0 : i32
    %c0_i32_0 = arith.constant 0 : i32
    %c0_i32_1 = arith.constant 0 : i32
    return %c0_i32, %c0_i32_0 : i32, i32
  }
  func.func @transform_4(%arg0: i32) -> (i32, i32) {
    %c0_i32 = arith.constant 0 : i32
    %c0_i32_0 = arith.constant 0 : i32
    %c0_i32_1 = arith.constant 0 : i32
    return %c0_i32, %c0_i32_0 : i32, i32
  }
  func.func @transform_5(%arg0: i32) -> (i32, i32) {
    %c0_i32 = arith.constant 0 : i32
    %c0_i32_0 = arith.constant 0 : i32
    %c0_i32_1 = arith.constant 0 : i32
    return %c0_i32, %c0_i32_0 : i32, i32
  }
  func.func @transform_6(%arg0: i32) -> (i32, i32) {
    %c0_i32 = arith.constant 0 : i32
    %c0_i32_0 = arith.constant 0 : i32
    %c0_i32_1 = arith.constant 0 : i32
    return %c0_i32, %c0_i32_0 : i32, i32
  }
  func.func @transform_7(%arg0: i32) -> (i32, i32) {
    %c0_i32 = arith.constant 0 : i32
    %c0_i32_0 = arith.constant 0 : i32
    %c0_i32_1 = arith.constant 0 : i32
    return %c0_i32, %c0_i32_0 : i32, i32
  }
  func.func @transform_8(%arg0: i32) -> (i32, i32) {
    %c0_i32 = arith.constant 0 : i32
    %c0_i32_0 = arith.constant 0 : i32
    %c0_i32_1 = arith.constant 0 : i32
    return %c0_i32, %c0_i32_0 : i32, i32
  }
  func.func @transform_9(%arg0: i32) -> (i32, i32) {
    %c0_i32 = arith.constant 0 : i32
    %c0_i32_0 = arith.constant 0 : i32
    %c0_i32_1 = arith.constant 0 : i32
    return %c0_i32, %c0_i32_0 : i32, i32
  }
  func.func @transform_10(%arg0: i32) -> (i32, i32) {
    %c0_i32 = arith.constant 0 : i32
    %c0_i32_0 = arith.constant 0 : i32
    return %arg0, %c0_i32 : i32, i32
  }
  func.func @transform_11(%arg0: i32) -> (i32, i32) {
    %c0_i32 = arith.constant 0 : i32
    %c0_i32_0 = arith.constant 0 : i32
    return %arg0, %c0_i32 : i32, i32
  }
}

</mosaic_0001>

<bundles_post_ra>
// kernel: vae_forward.1
= control target key start
LH: loop header
LB: loop body
LE: loop exit
PB: predicated region body
PF: predicated region fallthrough
CT: control target
= control target key end

     0   :  { %17 = vsyncpa [#allocation3], 0  ;;  %s4374_s0 = inlined_call_operand.vmem [shape: bf16[8,128], index: 0, kind: input, shape index: {}]   ;;  %s4375_s1 = inlined_call_operand.vmem [shape: bf16[8,128], index: 1, kind: input, shape index: {}]   ;;  %s4376_s2 = inlined_call_operand.hbm [shape: bf16[128,512], index: 2, kind: input, shape index: {}]   ;;  %s4377_s3 = inlined_call_operand.vmem [shape: f32[1,512], index: 3, kind: input, shape index: {}]   ;;  %s4378_s4 = inlined_call_operand.hbm [shape: bf16[512,256], index: 4, kind: input, shape index: {}]   ;;  %s4379_s5 = inlined_call_operand.vmem [shape: f32[1,256], index: 5, kind: input, shape index: {}]   ;;  %s4380_s6 = inlined_call_operand.hbm [shape: bf16[128,512], index: 6, kind: input, shape index: {}]   ;;  %s4381_s7 = inlined_call_operand.vmem [shape: f32[1,512], index: 7, kind: input, shape index: {}]   ;;  %s4382_s8 = inlined_call_operand.hbm [shape: bf16[512,896], index: 8, kind: input, shape index: {}]   ;;  %s4383_s9 = inlined_call_operand.vmem [shape: f32[1,896], index: 9, kind: input, shape index: {}]   ;;  %s4384_s10 = inlined_call_operand.vmem [shape: bf16[8,896], index: 10, kind: output, shape index: {0}]   ;;  %s4385_s11 = inlined_call_operand.vmem [shape: f32[8,256], index: 11, kind: output, shape index: {1}]  }
   0x1   :  { %18 = vsyncpa [#allocation5], 0 }
   0x2   :  { %19 = vsyncpa [#allocation8], 0  ;;  %s4129_s17 = smov [#allocation4]   ;;  %s4035_s21 = scalar_lea.hbm %s4378_s4, 8192 }
   0x3   :  { %s43_s18 = sshll.u32 %s4129_s17, 4  ;;  %p4036_p0 = scmp.ne.s32.totalorder %s4378_s4, %s4035_s21  ;;  %s44_s18 = int_to_ptr.vmem [resolvable:$true] %s43_s18 }
   0x4   :  { %p4039_p1 = scmp.lt.u32.totalorder %s4035_s21, %s4378_s4 }
   0x6   :  { %p4041_p2 = pnand %p4039_p1, %p4036_p0 }
   0x8   :  { %4044 = shalt.err (!%p4041_p2)
}
   0x9   :  { %s4045_s26 = scalar_lea.vmem %s44_s18, 8192  ;;  %p4050_p4 = scmp.lt.s32.totalorder %s44_s18, %s44_s18 }
   0xa   :  { %p4046_p3 = scmp.ne.s32.totalorder %s44_s18, %s4045_s26  ;;  %p4051_p5 = scmp.lt.s32.totalorder %s4045_s26, %s4045_s26 }
   0xc   :  { %p4052_p6 = por %p4051_p5, %p4050_p4 }
   0xe   :  { %p4053_p7 = pnand %p4052_p6, %p4046_p3 }
  0x10   :  { %4056 = shalt.err (!%p4053_p7)
}
  0x11   :  { %s4130_s27 = smov 128   ;;  %s4131_s28 = smov 8  }
  0x12   :  { %49 = dma.hbm_to_vmem [thread:$0]  %s4378_s4, 8192, %s44_s18, [#allocation5], %s4130_s27, %s4130_s27, %s4131_s28  }
  0x13   :  { %s4132_s12 = smov [#allocation2]   ;;  %s4057_s16 = scalar_lea.hbm %s4376_s2, 4096 }
  0x14   :  { %s29_s13 = sshll.u32 %s4132_s12, 4  ;;  %p4058_p8 = scmp.ne.s32.totalorder %s4376_s2, %s4057_s16  ;;  %s30_s13 = int_to_ptr.vmem [resolvable:$true] %s29_s13 }
  0x15   :  { %p4061_p9 = scmp.lt.u32.totalorder %s4057_s16, %s4376_s2 }
  0x17   :  { %p4063_p10 = pnand %p4061_p9, %p4058_p8 }
  0x19   :  { %4066 = shalt.err (!%p4063_p10)
}
  0x1a   :  { %s4067_s22 = scalar_lea.vmem %s30_s13, 4096  ;;  %p4072_p12 = scmp.lt.s32.totalorder %s30_s13, %s30_s13 }
  0x1b   :  { %p4068_p11 = scmp.ne.s32.totalorder %s30_s13, %s4067_s22  ;;  %p4073_p13 = scmp.lt.s32.totalorder %s4067_s22, %s4067_s22 }
  0x1d   :  { %p4074_p0 = por %p4073_p13, %p4072_p12 }
  0x1f   :  { %p4075_p1 = pnand %p4074_p0, %p4068_p11 }
  0x21   :  { %4078 = shalt.err (!%p4075_p1)
}
  0x22   :  { %s4133_s4 = smov 256   ;;  %s4134_s18 = smov 16  }
  0x23   :  { %35 = dma.hbm_to_vmem [thread:$0]  %s4376_s2, 4096, %s30_s13, [#allocation3], %s4133_s4, %s4133_s4, %s4134_s18  }
  0x24   :  { %s4135_s25 = smov [#allocation6]   ;;  %s4136_s27 = smov [#allocation7]  }
  0x25   :  { %s57_s26 = sshll.u32 %s4135_s25, 4  ;;  %s71_s28 = sshll.u32 %s4136_s27, 4  ;;  %s58_s26 = int_to_ptr.vmem [resolvable:$true] %s57_s26  ;;  %s4224_s28 = int_to_ptr.vmem [resolvable:$true] %s71_s28 }
  0x26   :  { %s4079_s12 = scalar_lea.hbm %s4380_s6, 4096 }
  0x27   :  { %p4080_p2 = scmp.ne.s32.totalorder %s4380_s6, %s4079_s12  ;;  %p4083_p3 = scmp.lt.u32.totalorder %s4079_s12, %s4380_s6 }
  0x29   :  { %p4085_p4 = pnand %p4083_p3, %p4080_p2 }
  0x2b   :  { %4088 = shalt.err (!%p4085_p4)
}
  0x2c   :  { %s4089_s2 = scalar_lea.vmem %s58_s26, 4096  ;;  %p4094_p6 = scmp.lt.s32.totalorder %s58_s26, %s58_s26 }
  0x2d   :  { %p4090_p5 = scmp.ne.s32.totalorder %s58_s26, %s4089_s2  ;;  %p4095_p7 = scmp.lt.s32.totalorder %s4089_s2, %s4089_s2 }
  0x2f   :  { %p4096_p8 = por %p4095_p7, %p4094_p6 }
  0x31   :  { %p4097_p9 = pnand %p4096_p8, %p4090_p5 }
  0x33   :  { %4100 = shalt.err (!%p4097_p9)
}
  0x34   :  { %63 = dma.hbm_to_vmem [thread:$0]  %s4380_s6, 4096, %s58_s26, [#allocation5], %s4133_s4, %s4133_s4, %s4134_s18  }
  0x35   :  { %s4101_s22 = scalar_lea.hbm %s4382_s8, 28672 }
  0x36   :  { %p4102_p10 = scmp.ne.s32.totalorder %s4382_s8, %s4101_s22  ;;  %p4105_p11 = scmp.lt.u32.totalorder %s4101_s22, %s4382_s8 }
  0x38   :  { %p4107_p12 = pnand %p4105_p11, %p4102_p10 }
  0x3a   :  { %4110 = shalt.err (!%p4107_p12)
}
  0x3b   :  { %s4111_s29 = scalar_lea.vmem %s4224_s28, 28672  ;;  %p4116_p0 = scmp.lt.s32.totalorder %s4224_s28, %s4224_s28 }
  0x3c   :  { %p4112_p13 = scmp.ne.s32.totalorder %s4224_s28, %s4111_s29  ;;  %p4117_p1 = scmp.lt.s32.totalorder %s4111_s29, %s4111_s29 }
  0x3e   :  { %p4118_p2 = por %p4117_p1, %p4116_p0 }
  0x40   :  { %p4119_p3 = pnand %p4118_p2, %p4112_p13 }
  0x42   :  { %4122 = shalt.err (!%p4119_p3)
}
  0x43   :  { %s4137_s6 = smov 448   ;;  %s4138_s4 = smov 28  }
  0x44   :  { %77 = dma.hbm_to_vmem [thread:$0]  %s4382_s8, 28672, %s4224_s28, [#allocation8], %s4137_s6, %s4137_s6, %s4138_s4  }
  0x45   :  { %4123 = dma.done.wait [#allocation3], 4096  }
  0x46   :  { %4124 = vsyncadd [#allocation3], 4294963200 }
  0x47   :  { %4125 = dma.done.wait [#allocation5], 12288  }
  0x48   :  { %4126 = vsyncadd [#allocation5], 4294955008 }
  0x49   :  { %4127 = dma.done.wait [#allocation8], 28672  }
  0x4a   :  { %4128 = vsyncadd [#allocation8], 4294938624  ;;  %v4139_v0 = vmov 0   ;;  %v3493_v1 = vld [vmem:[#allocation2 + $0x4] ss:$16 sps:$4 sm:$0xff]  }
  0x4b   :  { %340 = vmatprep.mubr.bf16.mxu0 %v4139_v0  ;;  %381 = vmatprep.mubr.bf16.mxu1 %v4139_v0  ;;  %v3495_v2 = vld [vmem:[#allocation2] ss:$16 sps:$4 sm:$0xff]   ;;  %v3496_v3 = vld [vmem:[#allocation2 + $0x24] ss:$16 sps:$4 sm:$0xff]   ;;  %v3517_v10 = vld [vmem:[#allocation2 + $0xc] ss:$16 sps:$4 sm:$0xff]  }
  0x4c   :  { %308 = vmatprep.subr.bf16.mxu0 %v3493_v1  ;;  %v3498_v4 = vld [vmem:[#allocation2 + $0x20] ss:$16 sps:$4 sm:$0xff]   ;;  %v3499_v5 = vld [vmem:[#allocation2 + $0x44] ss:$16 sps:$4 sm:$0xff]   ;;  %v3519_v11 = vld [vmem:[#allocation2 + $0x8] ss:$16 sps:$4 sm:$0xff]   ;;  %349 = vmatprep.subr.bf16.mxu1 %v3517_v10 }
  0x4d   :  { %309 = vmatpush1.bf16.msra.mxu0 %v3495_v2  ;;  %v3501_v6 = vld [vmem:[#allocation2 + $0x40] ss:$16 sps:$4 sm:$0xff]   ;;  %v3502_v7 = vld [vmem:[#allocation2 + $0x64] ss:$16 sps:$4 sm:$0xff]   ;;  %v3520_v12 = vld [vmem:[#allocation2 + $0x2c] ss:$16 sps:$4 sm:$0xff]   ;;  %350 = vmatpush1.bf16.msra.mxu1 %v3519_v11 }
  0x4e   :  { %310 = vmatprep.subr.bf16.mxu0 %v3496_v3  ;;  %v3504_v8 = vld [vmem:[#allocation2 + $0x60] ss:$16 sps:$4 sm:$0xff]   ;;  %v3505_v9 = vld [vmem:[#allocation2 + $0x84] ss:$16 sps:$4 sm:$0xff]   ;;  %v3522_v14 = vld [vmem:[#allocation2 + $0x28] ss:$16 sps:$4 sm:$0xff]   ;;  %351 = vmatprep.subr.bf16.mxu1 %v3520_v12 }
  0x4f   :  { %v3507_v13 = vld [vmem:[#allocation2 + $0x80] ss:$16 sps:$4 sm:$0xff]   ;;  %v3523_v15 = vld [vmem:[#allocation2 + $0x4c] ss:$16 sps:$4 sm:$0xff]   ;;  %v3508_v16 = vld [vmem:[#allocation2 + $0xa4] ss:$16 sps:$4 sm:$0xff]  }
  0x50   :  { %v3510_v17 = vld [vmem:[#allocation2 + $0xa0] ss:$16 sps:$4 sm:$0xff]   ;;  %v3525_v18 = vld [vmem:[#allocation2 + $0x48] ss:$16 sps:$4 sm:$0xff]   ;;  %v3526_v19 = vld [vmem:[#allocation2 + $0x6c] ss:$16 sps:$4 sm:$0xff]  }
  0x51   :  { %311 = vmatpush1.bf16.msra.mxu0 %v3498_v4  ;;  %352 = vmatpush1.bf16.msra.mxu1 %v3522_v14  ;;  %v3511_v20 = vld [vmem:[#allocation2 + $0xc4] ss:$16 sps:$4 sm:$0xff]   ;;  %v3513_v21 = vld [vmem:[#allocation2 + $0xc0] ss:$16 sps:$4 sm:$0xff]   ;;  %v3528_v22 = vld [vmem:[#allocation2 + $0x68] ss:$16 sps:$4 sm:$0xff]  }
  0x52   :  { %312 = vmatprep.subr.bf16.mxu0 %v3499_v5  ;;  %353 = vmatprep.subr.bf16.mxu1 %v3523_v15  ;;  %v3529_v23 = vld [vmem:[#allocation2 + $0x8c] ss:$16 sps:$4 sm:$0xff]   ;;  %v3514_v24 = vld [vmem:[#allocation2 + $0xe4] ss:$16 sps:$4 sm:$0xff]   ;;  %v3516_v25 = vld [vmem:[#allocation2 + $0xe0] ss:$16 sps:$4 sm:$0xff]  }
  0x53   :  { %v3531_v26 = vld [vmem:[#allocation2 + $0x88] ss:$16 sps:$4 sm:$0xff]   ;;  %v3532_v27 = vld [vmem:[#allocation2 + $0xac] ss:$16 sps:$4 sm:$0xff]   ;;  %v93_v29 = vld [vmem:[%s4374_s0] sm:$0xf] }
  0x54   :  { %v3543_v28 = vld [vmem:[#allocation4 + $0x4] ss:$8 sps:$4 sm:$0xff]   ;;  %v3534_v30 = vld [vmem:[#allocation2 + $0xa8] ss:$16 sps:$4 sm:$0xff]   ;;  %v3546_v33 = vld [vmem:[#allocation4 + $0x14] ss:$8 sps:$4 sm:$0xff]  }
  0x55   :  { %313 = vmatpush1.bf16.msra.mxu0 %v3501_v6  ;;  %354 = vmatpush1.bf16.msra.mxu1 %v3525_v18  ;;  %v3535_v31 = vld [vmem:[#allocation2 + $0xcc] ss:$16 sps:$4 sm:$0xff]   ;;  %v3541_v32 = vld [vmem:[#allocation4] ss:$8 sps:$4 sm:$0xff]   ;;  %v3544_v36 = vld [vmem:[#allocation4 + $0x10] ss:$8 sps:$4 sm:$0xff]  }
  0x56   :  { %314 = vmatprep.subr.bf16.mxu0 %v3502_v7  ;;  %355 = vmatprep.subr.bf16.mxu1 %v3526_v19  ;;  %v3537_v34 = vld [vmem:[#allocation2 + $0xc8] ss:$16 sps:$4 sm:$0xff]   ;;  %v3538_v35 = vld [vmem:[#allocation2 + $0xec] ss:$16 sps:$4 sm:$0xff]   ;;  %v3637_v4 = vld [vmem:[#allocation6] ss:$16 sps:$4 sm:$0xff]  }
  0x57   :  { %v3549_v37 = vld [vmem:[#allocation4 + $0x24] ss:$8 sps:$4 sm:$0xff]   ;;  %v3540_v38 = vld [vmem:[#allocation2 + $0xe8] ss:$16 sps:$4 sm:$0xff]   ;;  %v3552_v40 = vld [vmem:[#allocation4 + $0x34] ss:$8 sps:$4 sm:$0xff]  }
  0x58   :  { %v3547_v39 = vld [vmem:[#allocation4 + $0x20] ss:$8 sps:$4 sm:$0xff]   ;;  %v3550_v41 = vld [vmem:[#allocation4 + $0x30] ss:$8 sps:$4 sm:$0xff]   ;;  %v3555_v42 = vld [vmem:[#allocation4 + $0x44] ss:$8 sps:$4 sm:$0xff]  }
  0x59   :  { %315 = vmatpush1.bf16.msra.mxu0 %v3504_v8  ;;  %356 = vmatpush1.bf16.msra.mxu1 %v3528_v22  ;;  %v3553_v43 = vld [vmem:[#allocation4 + $0x40] ss:$8 sps:$4 sm:$0xff]   ;;  %v3558_v44 = vld [vmem:[#allocation4 + $0x54] ss:$8 sps:$4 sm:$0xff]   ;;  %v3556_v45 = vld [vmem:[#allocation4 + $0x50] ss:$8 sps:$4 sm:$0xff]   ;;  %v128_v8 = vlaneseq }
  0x5a   :  { %316 = vmatprep.subr.bf16.mxu0 %v3505_v9  ;;  %357 = vmatprep.subr.bf16.mxu1 %v3529_v23  ;;  %v3561_v46 = vld [vmem:[#allocation4 + $0x64] ss:$8 sps:$4 sm:$0xff]   ;;  %v3559_v47 = vld [vmem:[#allocation4 + $0x60] ss:$8 sps:$4 sm:$0xff]   ;;  %v3564_v48 = vld [vmem:[#allocation4 + $0x74] ss:$8 sps:$4 sm:$0xff]  }
  0x5b   :  { %v3562_v49 = vld [vmem:[#allocation4 + $0x70] ss:$8 sps:$4 sm:$0xff]   ;;  %v3567_v50 = vld [vmem:[#allocation4 + $0x84] ss:$8 sps:$4 sm:$0xff]   ;;  %v3565_v51 = vld [vmem:[#allocation4 + $0x80] ss:$8 sps:$4 sm:$0xff]  }
  0x5c   :  { %v3570_v52 = vld [vmem:[#allocation4 + $0x94] ss:$8 sps:$4 sm:$0xff]   ;;  %v3568_v53 = vld [vmem:[#allocation4 + $0x90] ss:$8 sps:$4 sm:$0xff]   ;;  %v3573_v54 = vld [vmem:[#allocation4 + $0xa4] ss:$8 sps:$4 sm:$0xff]  }
  0x5d   :  { %317 = vmatpush1.bf16.msra.mxu0 %v3507_v13  ;;  %358 = vmatpush1.bf16.msra.mxu1 %v3531_v26  ;;  %v3571_v55 = vld [vmem:[#allocation4 + $0xa0] ss:$8 sps:$4 sm:$0xff]   ;;  %v3576_v56 = vld [vmem:[#allocation4 + $0xb4] ss:$8 sps:$4 sm:$0xff]   ;;  %v3574_v57 = vld [vmem:[#allocation4 + $0xb0] ss:$8 sps:$4 sm:$0xff]  }
  0x5e   :  { %318 = vmatprep.subr.bf16.mxu0 %v3508_v16  ;;  %359 = vmatprep.subr.bf16.mxu1 %v3532_v27  ;;  %v3579_v58 = vld [vmem:[#allocation4 + $0xc4] ss:$8 sps:$4 sm:$0xff]   ;;  %v3577_v59 = vld [vmem:[#allocation4 + $0xc0] ss:$8 sps:$4 sm:$0xff]   ;;  %v3582_v60 = vld [vmem:[#allocation4 + $0xd4] ss:$8 sps:$4 sm:$0xff]  }
  0x5f   :  { %v3580_v61 = vld [vmem:[#allocation4 + $0xd0] ss:$8 sps:$4 sm:$0xff]   ;;  %v3585_v62 = vld [vmem:[#allocation4 + $0xe4] ss:$8 sps:$4 sm:$0xff]   ;;  %v3583_v63 = vld [vmem:[#allocation4 + $0xe0] ss:$8 sps:$4 sm:$0xff]  }
  0x60   :  { %v3588_v1 = vld [vmem:[#allocation4 + $0xf4] ss:$8 sps:$4 sm:$0xff]   ;;  %v3586_v2 = vld [vmem:[#allocation4 + $0xf0] ss:$8 sps:$4 sm:$0xff]   ;;  %v3591_v3 = vld [vmem:[#allocation4 + $0x104] ss:$8 sps:$4 sm:$0xff]  }
  0x61   :  { %319 = vmatpush1.bf16.msra.mxu0 %v3510_v17  ;;  %360 = vmatpush1.bf16.msra.mxu1 %v3534_v30  ;;  %v3639_v5 = vld [vmem:[#allocation6 + $0x4] ss:$16 sps:$4 sm:$0xff]   ;;  %v3640_v7 = vld [vmem:[#allocation6 + $0x20] ss:$16 sps:$4 sm:$0xff]   ;;  %v4261_v9 = vshrl.u32 %v128_v8, 7 }
  0x62   :  { %320 = vmatprep.subr.bf16.mxu0 %v3511_v20  ;;  %361 = vmatprep.subr.bf16.mxu1 %v3535_v31  ;;  %v3642_v6 = vld [vmem:[#allocation6 + $0x24] ss:$16 sps:$4 sm:$0xff]   ;;  %v4269_v11 = vld [vmem:[%s4377_s3] sm:$0xf] }
  0x63   :  { %v4264_v10 = vsub.s32 0, %v4261_v9  ;;  %v4272_v12 = vsub.s32 1, %v4261_v9  ;;  %v4279_v23 = vsub.s32 3, %v4261_v9  ;;  %v3594_v27 = vld [vmem:[#allocation4 + $0x114] ss:$8 sps:$4 sm:$0xff]  }
  0x64   :  { %v3597_v30 = vld [vmem:[#allocation4 + $0x124] ss:$8 sps:$4 sm:$0xff]   ;;  %v3643_v8 = vld [vmem:[#allocation6 + $0x40] ss:$16 sps:$4 sm:$0xff]  }
  0x65   :  { %321 = vmatpush1.bf16.msra.mxu0 %v3513_v21  ;;  %362 = vmatpush1.bf16.msra.mxu1 %v3537_v34  ;;  %v131_v13 = vrot.slane %v4269_v11, %v4264_v10  ;;  %v135_v14 = vrot.slane %v4269_v11, %v4272_v12 }
  0x66   :  { %322 = vmatprep.subr.bf16.mxu0 %v3514_v24  ;;  %363 = vmatprep.subr.bf16.mxu1 %v3538_v35  ;;  %v3595_v35 = vld [vmem:[#allocation4 + $0x120] ss:$8 sps:$4 sm:$0xff]  }
  0x69   :  { %323 = vmatpush1.bf16.msra.mxu0 %v3516_v25  ;;  %364 = vmatpush1.bf16.msra.mxu1 %v3540_v38  ;;  %v3589_v25 = vld [vmem:[#allocation4 + $0x100] ss:$8 sps:$4 sm:$0xff]  }
  0x6a   :  { %794 = vmatprep.subr.bf16.mxu0 %v3543_v28  ;;  %1100 = vmatprep.subr.bf16.mxu1 %v3639_v5  ;;  %v143_v28 = vrot.slane %v4269_v11, %v4279_v23 }
  0x6c   :  { %341 = vmatmul.mubr.bf16.vlgmr.msra.gmra.mrb[0].mxu0 %v93_v29  ;;  %382 = vmatmul.mubr.bf16.vlgmr.msra.gmra.mrb[0].mxu1 %v93_v29  ;;  %v3592_v29 = vld [vmem:[#allocation4 + $0x110] ss:$8 sps:$4 sm:$0xff]  }
  0x6d   :  { %795 = vmatpush1.bf16.msra.mxu0 %v3541_v32  ;;  %1132 = vmatprep.mubr.bf16.mxu1 %v4139_v0 }
  0x6e   :  { %796 = vmatprep.subr.bf16.mxu0 %v3546_v33  ;;  %1101 = vmatpush1.bf16.msra.mxu1 %v3637_v4  ;;  %v3634_v4 = vld [vmem:[#allocation4 + $0x1f0] ss:$8 sps:$4 sm:$0xff]  }
  0x6f   :  { %1102 = vmatprep.subr.bf16.mxu1 %v3642_v6 }
  0x71   :  { %797 = vmatpush1.bf16.msra.mxu0 %v3544_v36 }
  0x72   :  { %798 = vmatprep.subr.bf16.mxu0 %v3549_v37  ;;  %1103 = vmatpush1.bf16.msra.mxu1 %v3640_v7  ;;  %v3600_v37 = vld [vmem:[#allocation4 + $0x134] ss:$8 sps:$4 sm:$0xff]  }
  0x73   :  { %v3645_v7 = vld [vmem:[#allocation6 + $0x44] ss:$16 sps:$4 sm:$0xff]  }
  0x74   :  { %1104 = vmatprep.subr.bf16.mxu1 %v3645_v7 }
  0x75   :  { %799 = vmatpush1.bf16.msra.mxu0 %v3547_v39 }
  0x76   :  { %800 = vmatprep.subr.bf16.mxu0 %v3552_v40  ;;  %v3598_v40 = vld [vmem:[#allocation4 + $0x130] ss:$8 sps:$4 sm:$0xff]   ;;  %1105 = vmatpush1.bf16.msra.mxu1 %v3643_v8  ;;  %v3666_v8 = vld [vmem:[#allocation6 + $0x2c] ss:$16 sps:$4 sm:$0xff]  }
  0x79   :  { %801 = vmatpush1.bf16.msra.mxu0 %v3550_v41  ;;  %v3603_v41 = vld [vmem:[#allocation4 + $0x144] ss:$8 sps:$4 sm:$0xff]  }
  0x7a   :  { %802 = vmatprep.subr.bf16.mxu0 %v3555_v42  ;;  %v3601_v42 = vld [vmem:[#allocation4 + $0x140] ss:$8 sps:$4 sm:$0xff]  }
  0x7d   :  { %803 = vmatpush1.bf16.msra.mxu0 %v3553_v43  ;;  %v3606_v43 = vld [vmem:[#allocation4 + $0x154] ss:$8 sps:$4 sm:$0xff]  }
  0x7e   :  { %804 = vmatprep.subr.bf16.mxu0 %v3558_v44  ;;  %v3604_v44 = vld [vmem:[#allocation4 + $0x150] ss:$8 sps:$4 sm:$0xff]  }
  0x81   :  { %805 = vmatpush1.bf16.msra.mxu0 %v3556_v45  ;;  %v3609_v45 = vld [vmem:[#allocation4 + $0x164] ss:$8 sps:$4 sm:$0xff]  }
  0x82   :  { %806 = vmatprep.subr.bf16.mxu0 %v3561_v46  ;;  %v3607_v46 = vld [vmem:[#allocation4 + $0x160] ss:$8 sps:$4 sm:$0xff]  }
  0x85   :  { %807 = vmatpush1.bf16.msra.mxu0 %v3559_v47  ;;  %v3612_v47 = vld [vmem:[#allocation4 + $0x174] ss:$8 sps:$4 sm:$0xff]  }
  0x86   :  { %808 = vmatprep.subr.bf16.mxu0 %v3564_v48  ;;  %v3610_v48 = vld [vmem:[#allocation4 + $0x170] ss:$8 sps:$4 sm:$0xff]  }
  0x89   :  { %809 = vmatpush1.bf16.msra.mxu0 %v3562_v49  ;;  %v3615_v49 = vld [vmem:[#allocation4 + $0x184] ss:$8 sps:$4 sm:$0xff]  }
  0x8a   :  { %810 = vmatprep.subr.bf16.mxu0 %v3567_v50  ;;  %v3613_v50 = vld [vmem:[#allocation4 + $0x180] ss:$8 sps:$4 sm:$0xff]  }
  0x8d   :  { %811 = vmatpush1.bf16.msra.mxu0 %v3565_v51  ;;  %v3618_v51 = vld [vmem:[#allocation4 + $0x194] ss:$8 sps:$4 sm:$0xff]  }
  0x8e   :  { %812 = vmatprep.subr.bf16.mxu0 %v3570_v52  ;;  %v3616_v52 = vld [vmem:[#allocation4 + $0x190] ss:$8 sps:$4 sm:$0xff]  }
  0x91   :  { %813 = vmatpush1.bf16.msra.mxu0 %v3568_v53  ;;  %v3621_v53 = vld [vmem:[#allocation4 + $0x1a4] ss:$8 sps:$4 sm:$0xff]  }
  0x92   :  { %814 = vmatprep.subr.bf16.mxu0 %v3573_v54  ;;  %v3619_v54 = vld [vmem:[#allocation4 + $0x1a0] ss:$8 sps:$4 sm:$0xff]  }
  0x95   :  { %815 = vmatpush1.bf16.msra.mxu0 %v3571_v55  ;;  %v3624_v55 = vld [vmem:[#allocation4 + $0x1b4] ss:$8 sps:$4 sm:$0xff]  }
  0x96   :  { %816 = vmatprep.subr.bf16.mxu0 %v3576_v56  ;;  %v3622_v56 = vld [vmem:[#allocation4 + $0x1b0] ss:$8 sps:$4 sm:$0xff]  }
  0x99   :  { %817 = vmatpush1.bf16.msra.mxu0 %v3574_v57  ;;  %v3627_v57 = vld [vmem:[#allocation4 + $0x1c4] ss:$8 sps:$4 sm:$0xff]  }
  0x9a   :  { %818 = vmatprep.subr.bf16.mxu0 %v3579_v58  ;;  %v3625_v58 = vld [vmem:[#allocation4 + $0x1c0] ss:$8 sps:$4 sm:$0xff]  }
  0x9d   :  { %819 = vmatpush1.bf16.msra.mxu0 %v3577_v59  ;;  %v4284_v59 = vsub.s32 2, %v4261_v9 }
  0x9e   :  { %820 = vmatprep.subr.bf16.mxu0 %v3582_v60  ;;  %v3630_v60 = vld [vmem:[#allocation4 + $0x1d4] ss:$8 sps:$4 sm:$0xff]  }
  0xa1   :  { %821 = vmatpush1.bf16.msra.mxu0 %v3580_v61  ;;  %v3628_v61 = vld [vmem:[#allocation4 + $0x1d0] ss:$8 sps:$4 sm:$0xff]  }
  0xa2   :  { %822 = vmatprep.subr.bf16.mxu0 %v3585_v62  ;;  %v139_v62 = vrot.slane %v4269_v11, %v4284_v59  ;;  %v3646_v11 = vld [vmem:[#allocation6 + $0x60] ss:$16 sps:$4 sm:$0xff]  }
  0xa5   :  { %823 = vmatpush1.bf16.msra.mxu0 %v3583_v63  ;;  %v3633_v63 = vld [vmem:[#allocation4 + $0x1e4] ss:$8 sps:$4 sm:$0xff]  }
  0xa6   :  { %824 = vmatprep.subr.bf16.mxu0 %v3588_v1  ;;  %v3631_v1 = vld [vmem:[#allocation4 + $0x1e0] ss:$8 sps:$4 sm:$0xff]  }
  0xa9   :  { %825 = vmatpush1.bf16.msra.mxu0 %v3586_v2 }
  0xaa   :  { %835 = vmatprep.subr.bf16.mxu0 %v3591_v3  ;;  %v3636_v3 = vld [vmem:[#allocation4 + $0x1f4] ss:$8 sps:$4 sm:$0xff]  }
 0x13f   :  { %v342_v15 = vpop.f32.mrb[0].mxu0  ;;  %v383_v31 = vpop.f32.mrb[0].mxu1 }
 0x140   :  { %v343_v16 = vadd.f32 %v342_v15, %v131_v13  ;;  %v344_v17 = vpop.f32.mrb[1].mxu0  ;;  %v385_v32 = vpop.f32.mrb[1].mxu1  ;;  %v384_v2 = vadd.f32 %v383_v31, %v139_v62  ;;  %v3648_v13 = vld [vmem:[#allocation6 + $0x64] ss:$16 sps:$4 sm:$0xff]   ;;  %v3649_v15 = vld [vmem:[#allocation6 + $0x80] ss:$16 sps:$4 sm:$0xff]  }
 0x141   :  { %v345_v18 = vadd.f32 %v344_v17, %v135_v14  ;;  %v346_v19 = vpop.f32.mrb[2].mxu0  ;;  %v386_v33 = vadd.f32 %v385_v32, %v143_v28  ;;  %v387_v34 = vpop.f32.mrb[2].mxu1  ;;  %1106 = vmatprep.subr.bf16.mxu1 %v3648_v13  ;;  %v3651_v14 = vld [vmem:[#allocation6 + $0x84] ss:$16 sps:$4 sm:$0xff]   ;;  %v3652_v17 = vld [vmem:[#allocation6 + $0xa0] ss:$16 sps:$4 sm:$0xff]  }
 0x142   :  { %v390_v20 = vmax.f32 %v343_v16, 0.0  ;;  %v347_v21 = vpop.f32.mrb[3].mxu0  ;;  %v388_v36 = vpop.f32.mrb[3].mxu1  ;;  %v392_v5 = vmax.f32 %v384_v2, 0.0  ;;  %1107 = vmatpush1.bf16.msra.mxu1 %v3646_v11  ;;  %v3654_v16 = vld [vmem:[#allocation6 + $0xa4] ss:$16 sps:$4 sm:$0xff]  }
 0x143   :  { %v391_v22 = vmax.f32 %v345_v18, 0.0  ;;  %v393_v38 = vmax.f32 %v386_v33, 0.0  ;;  %1108 = vmatprep.subr.bf16.mxu1 %v3651_v14  ;;  %v3657_v18 = vld [vmem:[#allocation6 + $0xc4] ss:$16 sps:$4 sm:$0xff]   ;;  %v3655_v19 = vld [vmem:[#allocation6 + $0xc0] ss:$16 sps:$4 sm:$0xff]  }
 0x144   :  { %v394_v26 = vpack.c.bf16 %v390_v20, %v390_v20  ;;  %v396_v6 = vpack.c.bf16 %v392_v5, %v392_v5  ;;  %v3660_v20 = vld [vmem:[#allocation6 + $0xe4] ss:$16 sps:$4 sm:$0xff]   ;;  %v3658_v21 = vld [vmem:[#allocation6 + $0xe0] ss:$16 sps:$4 sm:$0xff]   ;;  %v3702_v28 = vld [vmem:[#allocation7 + $0x7c] ss:$28 sps:$4 sm:$0xff]  }
 0x145   :  { %v395_v24 = vpack.c.bf16 %v391_v22, %v391_v22  ;;  %v397_v39 = vpack.c.bf16 %v393_v38, %v393_v38  ;;  %v3663_v22 = vld [vmem:[#allocation6 + $0xc] ss:$16 sps:$4 sm:$0xff]   ;;  %v3712_v33 = vld [vmem:[#allocation7 + $0xe8] ss:$28 sps:$4 sm:$0xff]   ;;  %v3732_v38 = vld [vmem:[#allocation7 + $0x194] ss:$28 sps:$4 sm:$0xff]  }
 0x146   :  { %1109 = vmatpush1.bf16.msra.mxu1 %v3649_v15  ;;  %v3706_v31 = vld [vmem:[#allocation7 + $0xb0] ss:$28 sps:$4 sm:$0xff]   ;;  %v3720_v34 = vld [vmem:[#allocation7 + $0x124] ss:$28 sps:$4 sm:$0xff]   ;;  %v3726_v36 = vld [vmem:[#allocation7 + $0x15c] ss:$28 sps:$4 sm:$0xff]  }
 0x147   :  { %826 = vmatprep.mubr.bf16.mxu0 %v395_v24  ;;  %1110 = vmatprep.subr.bf16.mxu1 %v3654_v16  ;;  %v3688_v24 = vld [vmem:[#allocation7 + $0x8] ss:$28 sps:$4 sm:$0xff]   ;;  %v3669_v11 = vld [vmem:[#allocation6 + $0x4c] ss:$16 sps:$4 sm:$0xff]  }
 0x148   :  { %827 = vmatmul.mubr.bf16.vlgmr.msra.gmra.mrb[4].mxu0 %v394_v26  ;;  %v3696_v26 = vld [vmem:[#allocation7 + $0x44] ss:$28 sps:$4 sm:$0xff]   ;;  %v3714_v32 = vld [vmem:[#allocation7 + $0xec] ss:$28 sps:$4 sm:$0xff]  }
 0x149   :  { %836 = vmatpush1.bf16.msra.mxu0 %v3589_v25  ;;  %867 = vmatprep.mubr.bf16.mxu0 %v397_v39  ;;  %v3690_v25 = vld [vmem:[#allocation7 + $0xc] ss:$28 sps:$4 sm:$0xff]  }
 0x14a   :  { %837 = vmatprep.subr.bf16.mxu0 %v3594_v27  ;;  %1111 = vmatpush1.bf16.msra.mxu1 %v3652_v17  ;;  %v3694_v27 = vld [vmem:[#allocation7 + $0x40] ss:$28 sps:$4 sm:$0xff]   ;;  %v3730_v39 = vld [vmem:[#allocation7 + $0x190] ss:$28 sps:$4 sm:$0xff]   ;;  %v3664_v13 = vld [vmem:[#allocation6 + $0x28] ss:$16 sps:$4 sm:$0xff]  }
 0x14b   :  { %1112 = vmatprep.subr.bf16.mxu1 %v3657_v18  ;;  %v3667_v14 = vld [vmem:[#allocation6 + $0x48] ss:$16 sps:$4 sm:$0xff]   ;;  %v3672_v15 = vld [vmem:[#allocation6 + $0x6c] ss:$16 sps:$4 sm:$0xff]  }
 0x14c   :  { %v3670_v16 = vld [vmem:[#allocation6 + $0x68] ss:$16 sps:$4 sm:$0xff]   ;;  %v3675_v17 = vld [vmem:[#allocation6 + $0x8c] ss:$16 sps:$4 sm:$0xff]  }
 0x14d   :  { %838 = vmatpush1.bf16.msra.mxu0 %v3592_v29  ;;  %v3700_v29 = vld [vmem:[#allocation7 + $0x78] ss:$28 sps:$4 sm:$0xff]  }
 0x14e   :  { %839 = vmatprep.subr.bf16.mxu0 %v3597_v30  ;;  %1113 = vmatpush1.bf16.msra.mxu1 %v3655_v19  ;;  %v3708_v30 = vld [vmem:[#allocation7 + $0xb4] ss:$28 sps:$4 sm:$0xff]   ;;  %v3673_v18 = vld [vmem:[#allocation6 + $0x88] ss:$16 sps:$4 sm:$0xff]   ;;  %v3678_v19 = vld [vmem:[#allocation6 + $0xac] ss:$16 sps:$4 sm:$0xff]  }
 0x14f   :  { %1114 = vmatprep.subr.bf16.mxu1 %v3660_v20  ;;  %v3676_v20 = vld [vmem:[#allocation6 + $0xa8] ss:$16 sps:$4 sm:$0xff]  }
 0x151   :  { %840 = vmatpush1.bf16.msra.mxu0 %v3595_v35  ;;  %v3718_v35 = vld [vmem:[#allocation7 + $0x120] ss:$28 sps:$4 sm:$0xff]  }
 0x152   :  { %841 = vmatprep.subr.bf16.mxu0 %v3600_v37  ;;  %1115 = vmatpush1.bf16.msra.mxu1 %v3658_v21  ;;  %v3724_v37 = vld [vmem:[#allocation7 + $0x158] ss:$28 sps:$4 sm:$0xff]   ;;  %v3681_v21 = vld [vmem:[#allocation6 + $0xcc] ss:$16 sps:$4 sm:$0xff]  }
 0x153   :  { %1141 = vmatprep.subr.bf16.mxu1 %v3663_v22  ;;  %v3684_v22 = vld [vmem:[#allocation6 + $0xec] ss:$16 sps:$4 sm:$0xff]  }
 0x155   :  { %842 = vmatpush1.bf16.msra.mxu0 %v3598_v40  ;;  %v3738_v40 = vld [vmem:[#allocation7 + $0x1cc] ss:$28 sps:$4 sm:$0xff]  }
 0x156   :  { %843 = vmatprep.subr.bf16.mxu0 %v3603_v41  ;;  %v3736_v41 = vld [vmem:[#allocation7 + $0x1c8] ss:$28 sps:$4 sm:$0xff]  }
 0x159   :  { %844 = vmatpush1.bf16.msra.mxu0 %v3601_v42  ;;  %v3744_v42 = vld [vmem:[#allocation7 + $0x204] ss:$28 sps:$4 sm:$0xff]  }
 0x15a   :  { %845 = vmatprep.subr.bf16.mxu0 %v3606_v43  ;;  %v3742_v43 = vld [vmem:[#allocation7 + $0x200] ss:$28 sps:$4 sm:$0xff]  }
 0x15d   :  { %846 = vmatpush1.bf16.msra.mxu0 %v3604_v44  ;;  %v3750_v44 = vld [vmem:[#allocation7 + $0x23c] ss:$28 sps:$4 sm:$0xff]  }
 0x15e   :  { %847 = vmatprep.subr.bf16.mxu0 %v3609_v45  ;;  %v3748_v45 = vld [vmem:[#allocation7 + $0x238] ss:$28 sps:$4 sm:$0xff]  }
 0x161   :  { %848 = vmatpush1.bf16.msra.mxu0 %v3607_v46  ;;  %v3756_v46 = vld [vmem:[#allocation7 + $0x274] ss:$28 sps:$4 sm:$0xff]  }
 0x162   :  { %849 = vmatprep.subr.bf16.mxu0 %v3612_v47  ;;  %v3754_v47 = vld [vmem:[#allocation7 + $0x270] ss:$28 sps:$4 sm:$0xff]  }
 0x165   :  { %850 = vmatpush1.bf16.msra.mxu0 %v3610_v48  ;;  %v3762_v48 = vld [vmem:[#allocation7 + $0x2ac] ss:$28 sps:$4 sm:$0xff]  }
 0x166   :  { %851 = vmatprep.subr.bf16.mxu0 %v3615_v49  ;;  %v3760_v49 = vld [vmem:[#allocation7 + $0x2a8] ss:$28 sps:$4 sm:$0xff]  }
 0x169   :  { %852 = vmatpush1.bf16.msra.mxu0 %v3613_v50  ;;  %v3768_v50 = vld [vmem:[#allocation7 + $0x2e4] ss:$28 sps:$4 sm:$0xff]  }
 0x16a   :  { %853 = vmatprep.subr.bf16.mxu0 %v3618_v51  ;;  %v3766_v51 = vld [vmem:[#allocation7 + $0x2e0] ss:$28 sps:$4 sm:$0xff]  }
 0x16d   :  { %854 = vmatpush1.bf16.msra.mxu0 %v3616_v52  ;;  %v462_v52 = vld [vmem:[%s4379_s5] sm:$0x3] }
 0x16e   :  { %855 = vmatprep.subr.bf16.mxu0 %v3621_v53  ;;  %v467_v53 = vrot.slane %v462_v52, %v4264_v10 }
 0x171   :  { %856 = vmatpush1.bf16.msra.mxu0 %v3619_v54  ;;  %v471_v54 = vrot.slane %v462_v52, %v4272_v12  ;;  %v3763_v52 = vld [vmem:[#allocation7 + $0x2d8] ss:$28 sps:$4 sm:$0xff]  }
 0x172   :  { %857 = vmatprep.subr.bf16.mxu0 %v3624_v55 }
 0x175   :  { %858 = vmatpush1.bf16.msra.mxu0 %v3622_v56 }
 0x176   :  { %859 = vmatprep.subr.bf16.mxu0 %v3627_v57 }
 0x179   :  { %860 = vmatpush1.bf16.msra.mxu0 %v3625_v58 }
 0x17a   :  { %861 = vmatprep.subr.bf16.mxu0 %v3630_v60 }
 0x17d   :  { %862 = vmatpush1.bf16.msra.mxu0 %v3628_v61 }
 0x17e   :  { %863 = vmatprep.subr.bf16.mxu0 %v3633_v63 }
 0x181   :  { %864 = vmatpush1.bf16.msra.mxu0 %v3631_v1  ;;  %v878_v1 = vld [vmem:[%s4375_s1] sm:$0xf] }
 0x182   :  { %865 = vmatprep.subr.bf16.mxu0 %v3636_v3  ;;  %v879_v2 = vunpack.c.l.bf16 %v878_v1  ;;  %v4306_v1 = vld [vmem:[%s4381_s7] sm:$0xf] }
 0x185   :  { %866 = vmatpush1.bf16.msra.mxu0 %v3634_v4 }
 0x186   :  { %2717 = vmatprep.subr.bf16.mxu0 %v3690_v25  ;;  %v3687_v25 = vld [vmem:[#allocation7 + $0x4] ss:$28 sps:$4 sm:$0xff]  }
 0x188   :  { %868 = vmatmul.mubr.bf16.vlgmr.msra.gmra.mrb[4].mxu0 %v396_v6  ;;  %v3661_v6 = vld [vmem:[#allocation6 + $0x8] ss:$16 sps:$4 sm:$0xff]  }
 0x189   :  { %2718 = vmatpush1.bf16.msra.mxu0 %v3688_v24  ;;  %v3682_v24 = vld [vmem:[#allocation6 + $0xe8] ss:$16 sps:$4 sm:$0xff]  }
 0x18a   :  { %2719 = vmatprep.subr.bf16.mxu0 %v3696_v26  ;;  %v3685_v26 = vld [vmem:[#allocation7] ss:$28 sps:$4 sm:$0xff]  }
 0x18d   :  { %2720 = vmatpush1.bf16.msra.mxu0 %v3694_v27  ;;  %v3693_v27 = vld [vmem:[#allocation7 + $0x3c] ss:$28 sps:$4 sm:$0xff]  }
 0x18e   :  { %2721 = vmatprep.subr.bf16.mxu0 %v3702_v28  ;;  %v3691_v28 = vld [vmem:[#allocation7 + $0x38] ss:$28 sps:$4 sm:$0xff]  }
 0x191   :  { %2722 = vmatpush1.bf16.msra.mxu0 %v3700_v29  ;;  %v3699_v29 = vld [vmem:[#allocation7 + $0x74] ss:$28 sps:$4 sm:$0xff]  }
 0x192   :  { %2723 = vmatprep.subr.bf16.mxu0 %v3708_v30  ;;  %v3697_v30 = vld [vmem:[#allocation7 + $0x70] ss:$28 sps:$4 sm:$0xff]  }
 0x195   :  { %2724 = vmatpush1.bf16.msra.mxu0 %v3706_v31  ;;  %v3705_v31 = vld [vmem:[#allocation7 + $0xac] ss:$28 sps:$4 sm:$0xff]  }
 0x196   :  { %2725 = vmatprep.subr.bf16.mxu0 %v3714_v32  ;;  %v3703_v32 = vld [vmem:[#allocation7 + $0xa8] ss:$28 sps:$4 sm:$0xff]  }
 0x199   :  { %2726 = vmatpush1.bf16.msra.mxu0 %v3712_v33  ;;  %v3711_v33 = vld [vmem:[#allocation7 + $0xe4] ss:$28 sps:$4 sm:$0xff]  }
 0x19a   :  { %2727 = vmatprep.subr.bf16.mxu0 %v3720_v34  ;;  %v3709_v34 = vld [vmem:[#allocation7 + $0xe0] ss:$28 sps:$4 sm:$0xff]  }
 0x19d   :  { %2728 = vmatpush1.bf16.msra.mxu0 %v3718_v35  ;;  %v3717_v35 = vld [vmem:[#allocation7 + $0x11c] ss:$28 sps:$4 sm:$0xff]  }
 0x19e   :  { %2729 = vmatprep.subr.bf16.mxu0 %v3726_v36  ;;  %v3715_v36 = vld [vmem:[#allocation7 + $0x118] ss:$28 sps:$4 sm:$0xff]  }
 0x1a1   :  { %2730 = vmatpush1.bf16.msra.mxu0 %v3724_v37  ;;  %v3723_v37 = vld [vmem:[#allocation7 + $0x154] ss:$28 sps:$4 sm:$0xff]  }
 0x1a2   :  { %2731 = vmatprep.subr.bf16.mxu0 %v3732_v38  ;;  %v3721_v38 = vld [vmem:[#allocation7 + $0x150] ss:$28 sps:$4 sm:$0xff]  }
 0x1a5   :  { %2732 = vmatpush1.bf16.msra.mxu0 %v3730_v39  ;;  %v3729_v39 = vld [vmem:[#allocation7 + $0x18c] ss:$28 sps:$4 sm:$0xff]  }
 0x1a6   :  { %2733 = vmatprep.subr.bf16.mxu0 %v3738_v40  ;;  %v3727_v40 = vld [vmem:[#allocation7 + $0x188] ss:$28 sps:$4 sm:$0xff]  }
 0x1a9   :  { %2734 = vmatpush1.bf16.msra.mxu0 %v3736_v41  ;;  %v3735_v41 = vld [vmem:[#allocation7 + $0x1c4] ss:$28 sps:$4 sm:$0xff]  }
 0x1aa   :  { %2735 = vmatprep.subr.bf16.mxu0 %v3744_v42  ;;  %v3733_v42 = vld [vmem:[#allocation7 + $0x1c0] ss:$28 sps:$4 sm:$0xff]  }
 0x1ad   :  { %2736 = vmatpush1.bf16.msra.mxu0 %v3742_v43  ;;  %v3741_v43 = vld [vmem:[#allocation7 + $0x1fc] ss:$28 sps:$4 sm:$0xff]  }
 0x1ae   :  { %2737 = vmatprep.subr.bf16.mxu0 %v3750_v44  ;;  %v3739_v44 = vld [vmem:[#allocation7 + $0x1f8] ss:$28 sps:$4 sm:$0xff]  }
 0x1b1   :  { %2738 = vmatpush1.bf16.msra.mxu0 %v3748_v45  ;;  %v3747_v45 = vld [vmem:[#allocation7 + $0x234] ss:$28 sps:$4 sm:$0xff]  }
 0x1b2   :  { %2739 = vmatprep.subr.bf16.mxu0 %v3756_v46  ;;  %v3745_v46 = vld [vmem:[#allocation7 + $0x230] ss:$28 sps:$4 sm:$0xff]  }
 0x1b5   :  { %2740 = vmatpush1.bf16.msra.mxu0 %v3754_v47  ;;  %v3753_v47 = vld [vmem:[#allocation7 + $0x26c] ss:$28 sps:$4 sm:$0xff]  }
 0x1b6   :  { %2741 = vmatprep.subr.bf16.mxu0 %v3762_v48  ;;  %v3751_v48 = vld [vmem:[#allocation7 + $0x268] ss:$28 sps:$4 sm:$0xff]  }
 0x1b9   :  { %2742 = vmatpush1.bf16.msra.mxu0 %v3760_v49  ;;  %v3759_v49 = vld [vmem:[#allocation7 + $0x2a4] ss:$28 sps:$4 sm:$0xff]  }
 0x1ba   :  { %2743 = vmatprep.subr.bf16.mxu0 %v3768_v50  ;;  %v3757_v50 = vld [vmem:[#allocation7 + $0x2a0] ss:$28 sps:$4 sm:$0xff]  }
 0x1bd   :  { %2744 = vmatpush1.bf16.msra.mxu0 %v3766_v51  ;;  %v3765_v51 = vld [vmem:[#allocation7 + $0x2dc] ss:$28 sps:$4 sm:$0xff]  }
 0x25b   :  { %v869_v55 = vpop.f32.mrb[4].mxu0 }
 0x25c   :  { %v3458_v56 = vadd.f32 %v869_v55, %v467_v53  ;;  %v871_v57 = vpop.f32.mrb[5].mxu0  ;;  %v3771_v53 = vld [vmem:[#allocation7 + $0x314] ss:$28 sps:$4 sm:$0xff]  }
 0x25d   :  { %v3459_v58 = vadd.f32 %v871_v57, %v471_v54  ;;  %v873_v60 = vpop.f32.mrb[6].mxu0  ;;  %v3774_v54 = vld [vmem:[#allocation7 + $0x31c] ss:$28 sps:$4 sm:$0xff]   ;;  %v3777_v57 = vld [vmem:[#allocation7 + $0x34c] ss:$28 sps:$4 sm:$0xff]  }
 0x25e   :  { %876 = vst [vmem:[%s4385_s11] sm:$0xff] %v3458_v56  ;;  %v874_v61 = vpop.f32.mrb[7].mxu0  ;;  %v3772_v55 = vld [vmem:[#allocation7 + $0x318] ss:$28 sps:$4 sm:$0xff]   ;;  %2745 = vmatprep.subr.bf16.mxu0 %v3774_v54  ;;  %v3778_v60 = vld [vmem:[#allocation7 + $0x350] ss:$28 sps:$4 sm:$0xff]  }
 0x25f   :  { %877 = vst [vmem:[%s4385_s11 + $0x8] sm:$0xff] %v3459_v58  ;;  %v880_v62 = vmul.f32 0.5, %v3459_v58  ;;  %2746 = vmatpush1.bf16.msra.mxu0 %v3772_v55  ;;  %v3780_v58 = vld [vmem:[#allocation7 + $0x354] ss:$28 sps:$4 sm:$0xff]   ;;  %v3775_v61 = vld [vmem:[#allocation7 + $0x348] ss:$28 sps:$4 sm:$0xff]  }
 0x260   :  { %2747 = vmatprep.subr.bf16.mxu0 %v3780_v58  ;;  %v3834_v54 = vld [vmem:[#allocation7 + $0x54c] ss:$28 sps:$4 sm:$0xff]  }
 0x261   :  { %v881_v63 = vmul.f32 1.442695, %v880_v62  ;;  %v3783_v62 = vld [vmem:[#allocation7 + $0x384] ss:$28 sps:$4 sm:$0xff]  }
 0x262   :  { %v3832_v58 = vld [vmem:[#allocation7 + $0x548] ss:$28 sps:$4 sm:$0xff]  }
 0x263   :  { %4005 = vpow2.f32 %v881_v63  ;;  %2748 = vmatpush1.bf16.msra.mxu0 %v3778_v60  ;;  %v3786_v63 = vld [vmem:[#allocation7 + $0x38c] ss:$28 sps:$4 sm:$0xff]   ;;  %v3837_v60 = vld [vmem:[#allocation7 + $0x57c] ss:$28 sps:$4 sm:$0xff]  }
 0x264   :  { %2758 = vmatprep.subr.bf16.mxu0 %v3786_v63  ;;  %v3838_v63 = vld [vmem:[#allocation7 + $0x580] ss:$28 sps:$4 sm:$0xff]  }
 0x26d   :  { %v4006_v3 = vpop.eup %4005 }
 0x26e   :  { %v883_v4 = vmul.f32 %v4006_v3, %v879_v2  ;;  %v923_v2 = vrot.slane %v4306_v1, %v4264_v10  ;;  %v927_v3 = vrot.slane %v4306_v1, %v4272_v12 }
 0x270   :  { %v884_v5 = vadd.f32 %v3458_v56, %v883_v4  ;;  %v3769_v56 = vld [vmem:[#allocation7 + $0x310] ss:$28 sps:$4 sm:$0xff]  }
 0x272   :  { %v885_v7 = vpack.c.bf16 %v884_v5, %v884_v5 }
 0x274   :  { %1133 = vmatmul.mubr.bf16.vlgmr.msra.gmra.mrb[4].mxu1 %v885_v7 }
 0x275   :  { %1142 = vmatpush1.bf16.msra.mxu1 %v3661_v6  ;;  %1173 = vmatprep.mubr.bf16.mxu1 %v4139_v0  ;;  %v3679_v0 = vld [vmem:[#allocation6 + $0xc8] ss:$16 sps:$4 sm:$0xff]  }
 0x276   :  { %1143 = vmatprep.subr.bf16.mxu1 %v3666_v8 }
 0x279   :  { %1144 = vmatpush1.bf16.msra.mxu1 %v3664_v13 }
 0x27a   :  { %1145 = vmatprep.subr.bf16.mxu1 %v3669_v11 }
 0x27d   :  { %1146 = vmatpush1.bf16.msra.mxu1 %v3667_v14 }
 0x27e   :  { %1147 = vmatprep.subr.bf16.mxu1 %v3672_v15 }
 0x281   :  { %1148 = vmatpush1.bf16.msra.mxu1 %v3670_v16  ;;  %v3781_v16 = vld [vmem:[#allocation7 + $0x380] ss:$28 sps:$4 sm:$0xff]  }
 0x282   :  { %1149 = vmatprep.subr.bf16.mxu1 %v3675_v17  ;;  %v3784_v17 = vld [vmem:[#allocation7 + $0x388] ss:$28 sps:$4 sm:$0xff]  }
 0x285   :  { %1150 = vmatpush1.bf16.msra.mxu1 %v3673_v18 }
 0x286   :  { %1151 = vmatprep.subr.bf16.mxu1 %v3678_v19  ;;  %v3789_v19 = vld [vmem:[#allocation7 + $0x3bc] ss:$28 sps:$4 sm:$0xff]  }
 0x289   :  { %1152 = vmatpush1.bf16.msra.mxu1 %v3676_v20  ;;  %v3792_v20 = vld [vmem:[#allocation7 + $0x3c4] ss:$28 sps:$4 sm:$0xff]  }
 0x28a   :  { %1153 = vmatprep.subr.bf16.mxu1 %v3681_v21  ;;  %v3787_v21 = vld [vmem:[#allocation7 + $0x3b8] ss:$28 sps:$4 sm:$0xff]  }
 0x28d   :  { %1154 = vmatpush1.bf16.msra.mxu1 %v3679_v0  ;;  %v3790_v0 = vld [vmem:[#allocation7 + $0x3c0] ss:$28 sps:$4 sm:$0xff]  }
 0x28e   :  { %1155 = vmatprep.subr.bf16.mxu1 %v3684_v22  ;;  %v3795_v22 = vld [vmem:[#allocation7 + $0x3f4] ss:$28 sps:$4 sm:$0xff]  }
 0x291   :  { %1156 = vmatpush1.bf16.msra.mxu1 %v3682_v24  ;;  %v3798_v24 = vld [vmem:[#allocation7 + $0x3fc] ss:$28 sps:$4 sm:$0xff]  }
 0x292   :  { %2635 = vmatprep.subr.bf16.mxu1 %v3687_v25  ;;  %v3793_v25 = vld [vmem:[#allocation7 + $0x3f0] ss:$28 sps:$4 sm:$0xff]  }
 0x294   :  { %1174 = vmatmul.mubr.bf16.vlgmr.msra.gmra.mrb[8].mxu1 %v885_v7 }
 0x295   :  { %2636 = vmatpush1.bf16.msra.mxu1 %v3685_v26  ;;  %v3796_v26 = vld [vmem:[#allocation7 + $0x3f8] ss:$28 sps:$4 sm:$0xff]  }
 0x296   :  { %2637 = vmatprep.subr.bf16.mxu1 %v3693_v27  ;;  %v3801_v27 = vld [vmem:[#allocation7 + $0x42c] ss:$28 sps:$4 sm:$0xff]  }
 0x299   :  { %2638 = vmatpush1.bf16.msra.mxu1 %v3691_v28  ;;  %v3804_v28 = vld [vmem:[#allocation7 + $0x434] ss:$28 sps:$4 sm:$0xff]  }
 0x29a   :  { %2639 = vmatprep.subr.bf16.mxu1 %v3699_v29  ;;  %v3799_v29 = vld [vmem:[#allocation7 + $0x428] ss:$28 sps:$4 sm:$0xff]  }
 0x29d   :  { %2640 = vmatpush1.bf16.msra.mxu1 %v3697_v30  ;;  %v3802_v30 = vld [vmem:[#allocation7 + $0x430] ss:$28 sps:$4 sm:$0xff]  }
 0x29e   :  { %2641 = vmatprep.subr.bf16.mxu1 %v3705_v31  ;;  %v3807_v31 = vld [vmem:[#allocation7 + $0x464] ss:$28 sps:$4 sm:$0xff]  }
 0x2a1   :  { %2642 = vmatpush1.bf16.msra.mxu1 %v3703_v32  ;;  %v3810_v32 = vld [vmem:[#allocation7 + $0x46c] ss:$28 sps:$4 sm:$0xff]  }
 0x2a2   :  { %2643 = vmatprep.subr.bf16.mxu1 %v3711_v33  ;;  %v3805_v33 = vld [vmem:[#allocation7 + $0x460] ss:$28 sps:$4 sm:$0xff]  }
 0x2a5   :  { %2644 = vmatpush1.bf16.msra.mxu1 %v3709_v34  ;;  %v3808_v34 = vld [vmem:[#allocation7 + $0x468] ss:$28 sps:$4 sm:$0xff]  }
 0x2a6   :  { %2645 = vmatprep.subr.bf16.mxu1 %v3717_v35  ;;  %v3813_v35 = vld [vmem:[#allocation7 + $0x49c] ss:$28 sps:$4 sm:$0xff]  }
 0x2a9   :  { %2646 = vmatpush1.bf16.msra.mxu1 %v3715_v36  ;;  %v3816_v36 = vld [vmem:[#allocation7 + $0x4a4] ss:$28 sps:$4 sm:$0xff]  }
 0x2aa   :  { %2647 = vmatprep.subr.bf16.mxu1 %v3723_v37  ;;  %v3811_v37 = vld [vmem:[#allocation7 + $0x498] ss:$28 sps:$4 sm:$0xff]  }
 0x2ad   :  { %2648 = vmatpush1.bf16.msra.mxu1 %v3721_v38  ;;  %v3814_v38 = vld [vmem:[#allocation7 + $0x4a0] ss:$28 sps:$4 sm:$0xff]  }
 0x2ae   :  { %2649 = vmatprep.subr.bf16.mxu1 %v3729_v39  ;;  %v3819_v39 = vld [vmem:[#allocation7 + $0x4d4] ss:$28 sps:$4 sm:$0xff]  }
 0x2b1   :  { %2650 = vmatpush1.bf16.msra.mxu1 %v3727_v40  ;;  %v3822_v40 = vld [vmem:[#allocation7 + $0x4dc] ss:$28 sps:$4 sm:$0xff]  }
 0x2b2   :  { %2651 = vmatprep.subr.bf16.mxu1 %v3735_v41  ;;  %v935_v41 = vrot.slane %v4306_v1, %v4279_v23 }
 0x2b5   :  { %2652 = vmatpush1.bf16.msra.mxu1 %v3733_v42  ;;  %v3817_v42 = vld [vmem:[#allocation7 + $0x4d0] ss:$28 sps:$4 sm:$0xff]  }
 0x2b6   :  { %2653 = vmatprep.subr.bf16.mxu1 %v3741_v43  ;;  %v3820_v43 = vld [vmem:[#allocation7 + $0x4d8] ss:$28 sps:$4 sm:$0xff]  }
 0x2b9   :  { %2654 = vmatpush1.bf16.msra.mxu1 %v3739_v44  ;;  %v3825_v44 = vld [vmem:[#allocation7 + $0x50c] ss:$28 sps:$4 sm:$0xff]  }
 0x2ba   :  { %2655 = vmatprep.subr.bf16.mxu1 %v3747_v45  ;;  %v3828_v45 = vld [vmem:[#allocation7 + $0x514] ss:$28 sps:$4 sm:$0xff]  }
 0x2bd   :  { %2656 = vmatpush1.bf16.msra.mxu1 %v3745_v46 }
 0x2be   :  { %2657 = vmatprep.subr.bf16.mxu1 %v3753_v47 }
 0x2c1   :  { %2658 = vmatpush1.bf16.msra.mxu1 %v3751_v48 }
 0x2c2   :  { %2659 = vmatprep.subr.bf16.mxu1 %v3759_v49 }
 0x2c5   :  { %2660 = vmatpush1.bf16.msra.mxu1 %v3757_v50  ;;  %v3823_v50 = vld [vmem:[#allocation7 + $0x508] ss:$28 sps:$4 sm:$0xff]  }
 0x2c6   :  { %2661 = vmatprep.subr.bf16.mxu1 %v3765_v51  ;;  %v3826_v51 = vld [vmem:[#allocation7 + $0x510] ss:$28 sps:$4 sm:$0xff]  }
 0x2c9   :  { %2662 = vmatpush1.bf16.msra.mxu1 %v3763_v52 }
 0x2ca   :  { %2663 = vmatprep.subr.bf16.mxu1 %v3771_v53  ;;  %v3831_v53 = vld [vmem:[#allocation7 + $0x544] ss:$28 sps:$4 sm:$0xff]  }
 0x2cd   :  { %2664 = vmatpush1.bf16.msra.mxu1 %v3769_v56 }
 0x2ce   :  { %2665 = vmatprep.subr.bf16.mxu1 %v3777_v57  ;;  %v3829_v57 = vld [vmem:[#allocation7 + $0x540] ss:$28 sps:$4 sm:$0xff]  }
 0x2d1   :  { %2666 = vmatpush1.bf16.msra.mxu1 %v3775_v61  ;;  %v3840_v61 = vld [vmem:[#allocation7 + $0x584] ss:$28 sps:$4 sm:$0xff]  }
 0x2d2   :  { %2676 = vmatprep.subr.bf16.mxu1 %v3783_v62  ;;  %v3835_v62 = vld [vmem:[#allocation7 + $0x578] ss:$28 sps:$4 sm:$0xff]  }
 0x347   :  { %v1134_v4 = vpop.f32.mrb[4].mxu1 }
 0x348   :  { %v1135_v5 = vadd.f32 %v1134_v4, %v923_v2  ;;  %v1136_v6 = vpop.f32.mrb[5].mxu1  ;;  %v3843_v2 = vld [vmem:[#allocation7 + $0x5b4] ss:$28 sps:$4 sm:$0xff]  }
 0x349   :  { %v1137_v7 = vadd.f32 %v1136_v6, %v927_v3  ;;  %v1138_v8 = vpop.f32.mrb[6].mxu1  ;;  %v3846_v3 = vld [vmem:[#allocation7 + $0x5bc] ss:$28 sps:$4 sm:$0xff]   ;;  %v3841_v4 = vld [vmem:[#allocation7 + $0x5b0] ss:$28 sps:$4 sm:$0xff]  }
 0x34a   :  { %v1182_v13 = vmax.f32 %v1135_v5, 0.0  ;;  %v1139_v11 = vpop.f32.mrb[7].mxu1  ;;  %v3844_v5 = vld [vmem:[#allocation7 + $0x5b8] ss:$28 sps:$4 sm:$0xff]   ;;  %v3849_v6 = vld [vmem:[#allocation7 + $0x5ec] ss:$28 sps:$4 sm:$0xff]  }
 0x34b   :  { %v1183_v14 = vmax.f32 %v1137_v7, 0.0  ;;  %v3852_v7 = vld [vmem:[#allocation7 + $0x5f4] ss:$28 sps:$4 sm:$0xff]   ;;  %v3847_v8 = vld [vmem:[#allocation7 + $0x5e8] ss:$28 sps:$4 sm:$0xff]  }
 0x34c   :  { %v4314_v18 = vpack.c.bf16 %v1182_v13, %v1182_v13  ;;  %v3850_v13 = vld [vmem:[#allocation7 + $0x5f0] ss:$28 sps:$4 sm:$0xff]   ;;  %v3855_v11 = vld [vmem:[#allocation7 + $0x624] ss:$28 sps:$4 sm:$0xff]  }
 0x34d   :  { %v4312_v15 = vpack.c.bf16 %v1183_v14, %v1183_v14  ;;  %v3858_v14 = vld [vmem:[#allocation7 + $0x62c] ss:$28 sps:$4 sm:$0xff]  }
 0x34f   :  { %2667 = vmatprep.mubr.bf16.mxu1 %v4312_v15  ;;  %2749 = vmatprep.mubr.bf16.mxu0 %v4312_v15 }
 0x350   :  { %2668 = vmatmul.mubr.bf16.vlgmr.msra.gmra.mrb[12].mxu1 %v4314_v18  ;;  %2750 = vmatmul.mubr.bf16.vlgmr.msra.gmra.mrb[8].mxu0 %v4314_v18 }
 0x351   :  { %2677 = vmatpush1.bf16.msra.mxu1 %v3781_v16  ;;  %2759 = vmatpush1.bf16.msra.mxu0 %v3784_v17  ;;  %v3853_v16 = vld [vmem:[#allocation7 + $0x620] ss:$28 sps:$4 sm:$0xff]   ;;  %v3856_v17 = vld [vmem:[#allocation7 + $0x628] ss:$28 sps:$4 sm:$0xff]  }
 0x352   :  { %2678 = vmatprep.subr.bf16.mxu1 %v3789_v19  ;;  %2760 = vmatprep.subr.bf16.mxu0 %v3792_v20  ;;  %v3861_v19 = vld [vmem:[#allocation7 + $0x65c] ss:$28 sps:$4 sm:$0xff]   ;;  %v3864_v20 = vld [vmem:[#allocation7 + $0x664] ss:$28 sps:$4 sm:$0xff]  }
 0x355   :  { %2679 = vmatpush1.bf16.msra.mxu1 %v3787_v21  ;;  %2761 = vmatpush1.bf16.msra.mxu0 %v3790_v0  ;;  %v3859_v21 = vld [vmem:[#allocation7 + $0x658] ss:$28 sps:$4 sm:$0xff]   ;;  %v3862_v0 = vld [vmem:[#allocation7 + $0x660] ss:$28 sps:$4 sm:$0xff]  }
 0x356   :  { %2680 = vmatprep.subr.bf16.mxu1 %v3795_v22  ;;  %2762 = vmatprep.subr.bf16.mxu0 %v3798_v24  ;;  %v931_v22 = vrot.slane %v4306_v1, %v4284_v59  ;;  %v3867_v24 = vld [vmem:[#allocation7 + $0x694] ss:$28 sps:$4 sm:$0xff]  }
 0x357   :  { %v3879_v1 = vld [vmem:[#allocation7 + $0x14] ss:$28 sps:$4 sm:$0xff]  }
 0x359   :  { %2681 = vmatpush1.bf16.msra.mxu1 %v3793_v25  ;;  %2763 = vmatpush1.bf16.msra.mxu0 %v3796_v26  ;;  %v3870_v25 = vld [vmem:[#allocation7 + $0x69c] ss:$28 sps:$4 sm:$0xff]   ;;  %v3865_v26 = vld [vmem:[#allocation7 + $0x690] ss:$28 sps:$4 sm:$0xff]  }
 0x35a   :  { %2682 = vmatprep.subr.bf16.mxu1 %v3801_v27  ;;  %2764 = vmatprep.subr.bf16.mxu0 %v3804_v28  ;;  %v3868_v27 = vld [vmem:[#allocation7 + $0x698] ss:$28 sps:$4 sm:$0xff]  }
 0x35d   :  { %2683 = vmatpush1.bf16.msra.mxu1 %v3799_v29  ;;  %2765 = vmatpush1.bf16.msra.mxu0 %v3802_v30  ;;  %v3873_v29 = vld [vmem:[#allocation7 + $0x6cc] ss:$28 sps:$4 sm:$0xff]   ;;  %v3876_v30 = vld [vmem:[#allocation7 + $0x6d4] ss:$28 sps:$4 sm:$0xff]  }
 0x35e   :  { %2684 = vmatprep.subr.bf16.mxu1 %v3807_v31  ;;  %2766 = vmatprep.subr.bf16.mxu0 %v3810_v32  ;;  %v3871_v31 = vld [vmem:[#allocation7 + $0x6c8] ss:$28 sps:$4 sm:$0xff]   ;;  %v3874_v32 = vld [vmem:[#allocation7 + $0x6d0] ss:$28 sps:$4 sm:$0xff]  }
 0x361   :  { %2685 = vmatpush1.bf16.msra.mxu1 %v3805_v33  ;;  %2767 = vmatpush1.bf16.msra.mxu0 %v3808_v34  ;;  %v3880_v34 = vld [vmem:[#allocation7 + $0x1d8] ss:$28 sps:$4 sm:$0xff]  }
 0x362   :  { %2686 = vmatprep.subr.bf16.mxu1 %v3813_v35  ;;  %2768 = vmatprep.subr.bf16.mxu0 %v3816_v36  ;;  %v3877_v35 = vld [vmem:[#allocation7 + $0x10] ss:$28 sps:$4 sm:$0xff]  }
 0x365   :  { %2687 = vmatpush1.bf16.msra.mxu1 %v3811_v37  ;;  %2769 = vmatpush1.bf16.msra.mxu0 %v3814_v38  ;;  %v3881_v37 = vld [vmem:[#allocation7 + $0x18] ss:$28 sps:$4 sm:$0xff]   ;;  %v3884_v38 = vld [vmem:[#allocation7 + $0x4c] ss:$28 sps:$4 sm:$0xff]  }
 0x366   :  { %2688 = vmatprep.subr.bf16.mxu1 %v3819_v39  ;;  %2770 = vmatprep.subr.bf16.mxu0 %v3822_v40  ;;  %v3885_v39 = vld [vmem:[#allocation7 + $0x210] ss:$28 sps:$4 sm:$0xff]   ;;  %v3882_v40 = vld [vmem:[#allocation7 + $0x48] ss:$28 sps:$4 sm:$0xff]  }
 0x367   :  { %v4322_v46 = vpop.f32.mrb[8].mxu1 }
 0x368   :  { %v1177_v47 = vpop.f32.mrb[9].mxu1  ;;  %v1176_v28 = vadd.f32 %v4322_v46, %v931_v22  ;;  %v3894_v46 = vld [vmem:[#allocation7 + $0xbc] ss:$28 sps:$4 sm:$0xff]  }
 0x369   :  { %v1178_v48 = vadd.f32 %v1177_v47, %v935_v41  ;;  %v1179_v49 = vpop.f32.mrb[10].mxu1  ;;  %2689 = vmatpush1.bf16.msra.mxu1 %v3817_v42  ;;  %2771 = vmatpush1.bf16.msra.mxu0 %v3820_v43  ;;  %v3886_v41 = vld [vmem:[#allocation7 + $0x50] ss:$28 sps:$4 sm:$0xff]   ;;  %v3889_v42 = vld [vmem:[#allocation7 + $0x84] ss:$28 sps:$4 sm:$0xff]  }
 0x36a   :  { %v1180_v52 = vpop.f32.mrb[11].mxu1  ;;  %2690 = vmatprep.subr.bf16.mxu1 %v3825_v44  ;;  %2772 = vmatprep.subr.bf16.mxu0 %v3828_v45  ;;  %v1184_v33 = vmax.f32 %v1176_v28, 0.0  ;;  %v3890_v43 = vld [vmem:[#allocation7 + $0x248] ss:$28 sps:$4 sm:$0xff]   ;;  %v3887_v44 = vld [vmem:[#allocation7 + $0x80] ss:$28 sps:$4 sm:$0xff]  }
 0x36b   :  { %v1185_v55 = vmax.f32 %v1178_v48, 0.0  ;;  %v3891_v45 = vld [vmem:[#allocation7 + $0x88] ss:$28 sps:$4 sm:$0xff]   ;;  %v3895_v47 = vld [vmem:[#allocation7 + $0x280] ss:$28 sps:$4 sm:$0xff]  }
 0x36c   :  { %v4331_v36 = vpack.c.bf16 %v1184_v33, %v1184_v33  ;;  %v3892_v48 = vld [vmem:[#allocation7 + $0xb8] ss:$28 sps:$4 sm:$0xff]   ;;  %v3896_v49 = vld [vmem:[#allocation7 + $0xc0] ss:$28 sps:$4 sm:$0xff]   ;;  %v3937_v28 = vld [vmem:[#allocation7 + $0x2b0] ss:$28 sps:$4 sm:$0xff]  }
 0x36d   :  { %v4324_v56 = vpack.c.bf16 %v1185_v55, %v1185_v55  ;;  %2691 = vmatpush1.bf16.msra.mxu1 %v3823_v50  ;;  %2773 = vmatpush1.bf16.msra.mxu0 %v3826_v51  ;;  %v3899_v50 = vld [vmem:[#allocation7 + $0xf4] ss:$28 sps:$4 sm:$0xff]   ;;  %v3902_v55 = vld [vmem:[#allocation7 + $0x128] ss:$28 sps:$4 sm:$0xff]   ;;  %v3935_v22 = vld [vmem:[#allocation7 + $0x600] ss:$28 sps:$4 sm:$0xff]  }
 0x36e   :  { %2692 = vmatprep.subr.bf16.mxu1 %v3831_v53  ;;  %2774 = vmatprep.subr.bf16.mxu0 %v3834_v54  ;;  %v3897_v51 = vld [vmem:[#allocation7 + $0xf0] ss:$28 sps:$4 sm:$0xff]   ;;  %v3901_v52 = vld [vmem:[#allocation7 + $0xf8] ss:$28 sps:$4 sm:$0xff]  }
 0x36f   :  { %2708 = vmatprep.mubr.bf16.mxu1 %v4324_v56  ;;  %2790 = vmatprep.mubr.bf16.mxu0 %v4324_v56  ;;  %v3904_v53 = vld [vmem:[#allocation7 + $0x12c] ss:$28 sps:$4 sm:$0xff]  }
 0x370   :  { %v3905_v54 = vld [vmem:[#allocation7 + $0x2f0] ss:$28 sps:$4 sm:$0xff]  }
 0x371   :  { %2693 = vmatpush1.bf16.msra.mxu1 %v3829_v57  ;;  %2775 = vmatpush1.bf16.msra.mxu0 %v3832_v58  ;;  %v3906_v57 = vld [vmem:[#allocation7 + $0x130] ss:$28 sps:$4 sm:$0xff]   ;;  %v3909_v58 = vld [vmem:[#allocation7 + $0x164] ss:$28 sps:$4 sm:$0xff]  }
 0x372   :  { %2694 = vmatprep.subr.bf16.mxu1 %v3837_v60  ;;  %2776 = vmatprep.subr.bf16.mxu0 %v3840_v61  ;;  %v3910_v60 = vld [vmem:[#allocation7 + $0x328] ss:$28 sps:$4 sm:$0xff]   ;;  %v3907_v61 = vld [vmem:[#allocation7 + $0x160] ss:$28 sps:$4 sm:$0xff]   ;;  %v3946_v33 = vld [vmem:[#allocation7 + $0x4b0] ss:$28 sps:$4 sm:$0xff]  }
 0x375   :  { %2695 = vmatpush1.bf16.msra.mxu1 %v3835_v62  ;;  %2777 = vmatpush1.bf16.msra.mxu0 %v3838_v63  ;;  %v3911_v62 = vld [vmem:[#allocation7 + $0x168] ss:$28 sps:$4 sm:$0xff]   ;;  %v3914_v63 = vld [vmem:[#allocation7 + $0x19c] ss:$28 sps:$4 sm:$0xff]  }
 0x376   :  { %2696 = vmatprep.subr.bf16.mxu1 %v3843_v2  ;;  %2778 = vmatprep.subr.bf16.mxu0 %v3846_v3  ;;  %v3915_v2 = vld [vmem:[#allocation7 + $0x360] ss:$28 sps:$4 sm:$0xff]   ;;  %v3912_v3 = vld [vmem:[#allocation7 + $0x198] ss:$28 sps:$4 sm:$0xff]  }
 0x379   :  { %2697 = vmatpush1.bf16.msra.mxu1 %v3841_v4  ;;  %2779 = vmatpush1.bf16.msra.mxu0 %v3844_v5  ;;  %v3916_v4 = vld [vmem:[#allocation7 + $0x1a0] ss:$28 sps:$4 sm:$0xff]   ;;  %v3919_v5 = vld [vmem:[#allocation7 + $0x1d4] ss:$28 sps:$4 sm:$0xff]  }
 0x37a   :  { %2698 = vmatprep.subr.bf16.mxu1 %v3849_v6  ;;  %2780 = vmatprep.subr.bf16.mxu0 %v3852_v7  ;;  %v3920_v6 = vld [vmem:[#allocation7 + $0x558] ss:$28 sps:$4 sm:$0xff]   ;;  %v3917_v7 = vld [vmem:[#allocation7 + $0x1d0] ss:$28 sps:$4 sm:$0xff]  }
 0x37d   :  { %2699 = vmatpush1.bf16.msra.mxu1 %v3847_v8  ;;  %2781 = vmatpush1.bf16.msra.mxu0 %v3850_v13  ;;  %v3921_v8 = vld [vmem:[#allocation7 + $0x398] ss:$28 sps:$4 sm:$0xff]   ;;  %v3924_v13 = vld [vmem:[#allocation7 + $0x20c] ss:$28 sps:$4 sm:$0xff]  }
 0x37e   :  { %2700 = vmatprep.subr.bf16.mxu1 %v3855_v11  ;;  %2782 = vmatprep.subr.bf16.mxu0 %v3858_v14  ;;  %v3925_v11 = vld [vmem:[#allocation7 + $0x590] ss:$28 sps:$4 sm:$0xff]   ;;  %v3922_v14 = vld [vmem:[#allocation7 + $0x208] ss:$28 sps:$4 sm:$0xff]  }
 0x381   :  { %2701 = vmatpush1.bf16.msra.mxu1 %v3853_v16  ;;  %2783 = vmatpush1.bf16.msra.mxu0 %v3856_v17  ;;  %v3926_v16 = vld [vmem:[#allocation7 + $0x3d0] ss:$28 sps:$4 sm:$0xff]   ;;  %v3929_v17 = vld [vmem:[#allocation7 + $0x244] ss:$28 sps:$4 sm:$0xff]  }
 0x382   :  { %2702 = vmatprep.subr.bf16.mxu1 %v3861_v19  ;;  %2784 = vmatprep.subr.bf16.mxu0 %v3864_v20  ;;  %v3930_v19 = vld [vmem:[#allocation7 + $0x5c8] ss:$28 sps:$4 sm:$0xff]   ;;  %v3927_v20 = vld [vmem:[#allocation7 + $0x240] ss:$28 sps:$4 sm:$0xff]  }
 0x385   :  { %2703 = vmatpush1.bf16.msra.mxu1 %v3859_v21  ;;  %2785 = vmatpush1.bf16.msra.mxu0 %v3862_v0  ;;  %v3931_v21 = vld [vmem:[#allocation7 + $0x408] ss:$28 sps:$4 sm:$0xff]   ;;  %v3934_v0 = vld [vmem:[#allocation7 + $0x27c] ss:$28 sps:$4 sm:$0xff]  }
 0x386   :  { %2704 = vmatprep.subr.bf16.mxu1 %v3867_v24  ;;  %2786 = vmatprep.subr.bf16.mxu0 %v3870_v25  ;;  %v3932_v24 = vld [vmem:[#allocation7 + $0x278] ss:$28 sps:$4 sm:$0xff]   ;;  %v3936_v25 = vld [vmem:[#allocation7 + $0x440] ss:$28 sps:$4 sm:$0xff]  }
 0x389   :  { %2705 = vmatpush1.bf16.msra.mxu1 %v3865_v26  ;;  %2787 = vmatpush1.bf16.msra.mxu0 %v3868_v27  ;;  %v3939_v26 = vld [vmem:[#allocation7 + $0x2b4] ss:$28 sps:$4 sm:$0xff]  }
 0x38a   :  { %2706 = vmatprep.subr.bf16.mxu1 %v3873_v29  ;;  %2788 = vmatprep.subr.bf16.mxu0 %v3876_v30  ;;  %v3940_v27 = vld [vmem:[#allocation7 + $0x638] ss:$28 sps:$4 sm:$0xff]   ;;  %v3944_v30 = vld [vmem:[#allocation7 + $0x2ec] ss:$28 sps:$4 sm:$0xff]  }
 0x38b   :  { %v3941_v29 = vld [vmem:[#allocation7 + $0x478] ss:$28 sps:$4 sm:$0xff]  }
 0x38d   :  { %2707 = vmatpush1.bf16.msra.mxu1 %v3871_v31  ;;  %2789 = vmatpush1.bf16.msra.mxu0 %v3874_v32  ;;  %v3945_v31 = vld [vmem:[#allocation7 + $0x670] ss:$28 sps:$4 sm:$0xff]   ;;  %v3942_v32 = vld [vmem:[#allocation7 + $0x2e8] ss:$28 sps:$4 sm:$0xff]  }
 0x38e   :  { %2799 = vmatprep.subr.bf16.mxu1 %v3879_v1  ;;  %3414 = vmatprep.subr.bf16.mxu0 %v3880_v34  ;;  %v3949_v1 = vld [vmem:[#allocation7 + $0x324] ss:$28 sps:$4 sm:$0xff]  }
 0x38f   :  { %v3950_v34 = vld [vmem:[#allocation7 + $0x6a8] ss:$28 sps:$4 sm:$0xff]  }
 0x390   :  { %2709 = vmatmul.mubr.bf16.vlgmr.msra.gmra.mrb[12].mxu1 %v4331_v36  ;;  %2791 = vmatmul.mubr.bf16.vlgmr.msra.gmra.mrb[8].mxu0 %v4331_v36 }
 0x391   :  { %2800 = vmatpush1.bf16.msra.mxu1 %v3877_v35  ;;  %2831 = vmatprep.mubr.bf16.mxu1 %v4312_v15  ;;  %v3947_v35 = vld [vmem:[#allocation7 + $0x320] ss:$28 sps:$4 sm:$0xff]  }
 0x392   :  { %3415 = vmatpush3.bf16.msra.mxu0 %v3881_v37  ;;  %2913 = vmatprep.mubr.bf16.mxu0 %v4312_v15  ;;  %v3900_v15 = vld [vmem:[#allocation7 + $0x2b8] ss:$28 sps:$4 sm:$0xff]   ;;  %v3951_v37 = vld [vmem:[#allocation7 + $0x4e8] ss:$28 sps:$4 sm:$0xff]  }
 0x393   :  { %2801 = vmatprep.subr.bf16.mxu1 %v3884_v38  ;;  %3416 = vmatprep.subr.bf16.mxu0 %v3885_v39  ;;  %v3954_v38 = vld [vmem:[#allocation7 + $0x35c] ss:$28 sps:$4 sm:$0xff]  }
 0x394   :  { %v3955_v39 = vld [vmem:[#allocation7 + $0x6e0] ss:$28 sps:$4 sm:$0xff]  }
 0x395   :  { %2802 = vmatpush1.bf16.msra.mxu1 %v3882_v40  ;;  %v3952_v40 = vld [vmem:[#allocation7 + $0x358] ss:$28 sps:$4 sm:$0xff]  }
 0x396   :  { %3417 = vmatpush3.bf16.msra.mxu0 %v3886_v41  ;;  %2803 = vmatprep.subr.bf16.mxu1 %v3889_v42  ;;  %v3956_v41 = vld [vmem:[#allocation7 + $0x520] ss:$28 sps:$4 sm:$0xff]   ;;  %v3959_v42 = vld [vmem:[#allocation7 + $0x394] ss:$28 sps:$4 sm:$0xff]  }
 0x397   :  { %3418 = vmatprep.subr.bf16.mxu0 %v3890_v43  ;;  %v3957_v43 = vld [vmem:[#allocation7 + $0x390] ss:$28 sps:$4 sm:$0xff]  }
 0x399   :  { %2804 = vmatpush1.bf16.msra.mxu1 %v3887_v44  ;;  %v3962_v44 = vld [vmem:[#allocation7 + $0x3cc] ss:$28 sps:$4 sm:$0xff]  }
 0x39a   :  { %3419 = vmatpush3.bf16.msra.mxu0 %v3891_v45  ;;  %2805 = vmatprep.subr.bf16.mxu1 %v3894_v46  ;;  %v3960_v45 = vld [vmem:[#allocation7 + $0x3c8] ss:$28 sps:$4 sm:$0xff]  }
 0x39b   :  { %3420 = vmatprep.subr.bf16.mxu0 %v3895_v47  ;;  %v3965_v46 = vld [vmem:[#allocation7 + $0x404] ss:$28 sps:$4 sm:$0xff]  }
 0x39c   :  { %v3963_v47 = vld [vmem:[#allocation7 + $0x400] ss:$28 sps:$4 sm:$0xff]  }
 0x39d   :  { %2806 = vmatpush1.bf16.msra.mxu1 %v3892_v48  ;;  %v3968_v48 = vld [vmem:[#allocation7 + $0x43c] ss:$28 sps:$4 sm:$0xff]  }
 0x39e   :  { %3421 = vmatpush3.bf16.msra.mxu0 %v3896_v49  ;;  %2807 = vmatprep.subr.bf16.mxu1 %v3899_v50  ;;  %v3966_v49 = vld [vmem:[#allocation7 + $0x438] ss:$28 sps:$4 sm:$0xff]  }
 0x39f   :  { %3422 = vmatprep.subr.bf16.mxu0 %v3900_v15  ;;  %v3971_v50 = vld [vmem:[#allocation7 + $0x474] ss:$28 sps:$4 sm:$0xff]  }
 0x3a0   :  { %v3969_v15 = vld [vmem:[#allocation7 + $0x470] ss:$28 sps:$4 sm:$0xff]  }
 0x3a1   :  { %2808 = vmatpush1.bf16.msra.mxu1 %v3897_v51  ;;  %v3972_v51 = vld [vmem:[#allocation7 + $0x4a8] ss:$28 sps:$4 sm:$0xff]  }
 0x3a2   :  { %3423 = vmatpush3.bf16.msra.mxu0 %v3901_v52  ;;  %2809 = vmatprep.subr.bf16.mxu1 %v3904_v53  ;;  %v3977_v52 = vld [vmem:[#allocation7 + $0x4e4] ss:$28 sps:$4 sm:$0xff]   ;;  %v3980_v53 = vld [vmem:[#allocation7 + $0x51c] ss:$28 sps:$4 sm:$0xff]  }
 0x3a3   :  { %3424 = vmatprep.subr.bf16.mxu0 %v3905_v54  ;;  %v3978_v54 = vld [vmem:[#allocation7 + $0x518] ss:$28 sps:$4 sm:$0xff]  }
 0x3a5   :  { %2810 = vmatpush1.bf16.msra.mxu1 %v3902_v55  ;;  %v3983_v55 = vld [vmem:[#allocation7 + $0x554] ss:$28 sps:$4 sm:$0xff]  }
 0x3a6   :  { %3425 = vmatpush3.bf16.msra.mxu0 %v3906_v57  ;;  %2811 = vmatprep.subr.bf16.mxu1 %v3909_v58  ;;  %v3981_v57 = vld [vmem:[#allocation7 + $0x550] ss:$28 sps:$4 sm:$0xff]  }
 0x3a7   :  { %3426 = vmatprep.subr.bf16.mxu0 %v3910_v60  ;;  %v3986_v58 = vld [vmem:[#allocation7 + $0x58c] ss:$28 sps:$4 sm:$0xff]  }
 0x3a8   :  { %v3984_v60 = vld [vmem:[#allocation7 + $0x588] ss:$28 sps:$4 sm:$0xff]  }
 0x3a9   :  { %2812 = vmatpush1.bf16.msra.mxu1 %v3907_v61  ;;  %v3989_v61 = vld [vmem:[#allocation7 + $0x5c4] ss:$28 sps:$4 sm:$0xff]  }
 0x3aa   :  { %3427 = vmatpush3.bf16.msra.mxu0 %v3911_v62  ;;  %2813 = vmatprep.subr.bf16.mxu1 %v3914_v63  ;;  %v3987_v62 = vld [vmem:[#allocation7 + $0x5c0] ss:$28 sps:$4 sm:$0xff]  }
 0x3ab   :  { %3428 = vmatprep.subr.bf16.mxu0 %v3915_v2  ;;  %v3992_v63 = vld [vmem:[#allocation7 + $0x5fc] ss:$28 sps:$4 sm:$0xff]  }
 0x3ac   :  { %v3990_v2 = vld [vmem:[#allocation7 + $0x5f8] ss:$28 sps:$4 sm:$0xff]  }
 0x3ad   :  { %2814 = vmatpush1.bf16.msra.mxu1 %v3912_v3  ;;  %v3995_v3 = vld [vmem:[#allocation7 + $0x634] ss:$28 sps:$4 sm:$0xff]  }
 0x3ae   :  { %3429 = vmatpush3.bf16.msra.mxu0 %v3916_v4  ;;  %2815 = vmatprep.subr.bf16.mxu1 %v3919_v5  ;;  %v3993_v4 = vld [vmem:[#allocation7 + $0x630] ss:$28 sps:$4 sm:$0xff]  }
 0x3af   :  { %3436 = vmatprep.subr.bf16.mxu0 %v3920_v6  ;;  %v3998_v5 = vld [vmem:[#allocation7 + $0x66c] ss:$28 sps:$4 sm:$0xff]  }
 0x3b0   :  { %v3996_v6 = vld [vmem:[#allocation7 + $0x668] ss:$28 sps:$4 sm:$0xff]  }
 0x3b1   :  { %2914 = vmatmul.mubr.bf16.vlgmr.msra.gmra.mrb[12].mxu0 %v4314_v18  ;;  %2816 = vmatpush1.bf16.msra.mxu1 %v3917_v7  ;;  %v4001_v7 = vld [vmem:[#allocation7 + $0x6a4] ss:$28 sps:$4 sm:$0xff]  }
 0x3b2   :  { %3437 = vmatpush3.bf16.msra.mxu0 %v3921_v8  ;;  %2953 = vmatprep.mubr.bf16.mxu0 %v4324_v56  ;;  %v3999_v8 = vld [vmem:[#allocation7 + $0x6a0] ss:$28 sps:$4 sm:$0xff]  }
 0x3b3   :  { %2817 = vmatprep.subr.bf16.mxu1 %v3924_v13  ;;  %3438 = vmatprep.subr.bf16.mxu0 %v3925_v11  ;;  %v4004_v13 = vld [vmem:[#allocation7 + $0x6dc] ss:$28 sps:$4 sm:$0xff]  }
 0x3b4   :  { %v4002_v11 = vld [vmem:[#allocation7 + $0x6d8] ss:$28 sps:$4 sm:$0xff]  }
 0x3b5   :  { %2818 = vmatpush1.bf16.msra.mxu1 %v3922_v14  ;;  %v4346_v14 = vld [vmem:[%s4383_s9] sm:$0xff] }
 0x3b6   :  { %3439 = vmatpush3.bf16.msra.mxu0 %v3926_v16  ;;  %2819 = vmatprep.subr.bf16.mxu1 %v3929_v17  ;;  %v1451_v16 = vrot.slane %v4346_v14, %v4264_v10  ;;  %v1459_v17 = vrot.slane %v4346_v14, %v4284_v59 }
 0x3b7   :  { %3440 = vmatprep.subr.bf16.mxu0 %v3930_v19  ;;  %v1455_v19 = vrot.slane %v4346_v14, %v4272_v12 }
 0x3b9   :  { %2820 = vmatpush1.bf16.msra.mxu1 %v3927_v20  ;;  %v1463_v20 = vrot.slane %v4346_v14, %v4279_v23 }
 0x3ba   :  { %3441 = vmatpush3.bf16.msra.mxu0 %v3931_v21  ;;  %2821 = vmatprep.subr.bf16.mxu1 %v3934_v0 }
 0x3bb   :  { %3442 = vmatprep.subr.bf16.mxu0 %v3935_v22 }
 0x3bd   :  { %2822 = vmatpush1.bf16.msra.mxu1 %v3932_v24 }
 0x3be   :  { %3443 = vmatpush3.bf16.msra.mxu0 %v3936_v25  ;;  %2823 = vmatprep.subr.bf16.mxu1 %v3939_v26 }
 0x3bf   :  { %3444 = vmatprep.subr.bf16.mxu0 %v3940_v27 }
 0x3c1   :  { %2824 = vmatpush1.bf16.msra.mxu1 %v3937_v28 }
 0x3c2   :  { %3445 = vmatpush3.bf16.msra.mxu0 %v3941_v29  ;;  %2825 = vmatprep.subr.bf16.mxu1 %v3944_v30 }
 0x3c3   :  { %3446 = vmatprep.subr.bf16.mxu0 %v3945_v31 }
 0x3c5   :  { %2826 = vmatpush1.bf16.msra.mxu1 %v3942_v32 }
 0x3c6   :  { %3447 = vmatpush3.bf16.msra.mxu0 %v3946_v33  ;;  %2827 = vmatprep.subr.bf16.mxu1 %v3949_v1 }
 0x3c7   :  { %3448 = vmatprep.subr.bf16.mxu0 %v3950_v34 }
 0x3c9   :  { %2828 = vmatpush1.bf16.msra.mxu1 %v3947_v35 }
 0x3ca   :  { %3449 = vmatpush3.bf16.msra.mxu0 %v3951_v37  ;;  %2829 = vmatprep.subr.bf16.mxu1 %v3954_v38 }
 0x3cb   :  { %3450 = vmatprep.subr.bf16.mxu0 %v3955_v39 }
 0x3cd   :  { %2830 = vmatpush1.bf16.msra.mxu1 %v3952_v40 }
 0x3ce   :  { %3451 = vmatpush3.bf16.msra.mxu0 %v3956_v41  ;;  %2840 = vmatprep.subr.bf16.mxu1 %v3959_v42 }
 0x3d0   :  { %2832 = vmatmul.mubr.bf16.vlgmr.msra.gmra.mrb[16].mxu1 %v4314_v18  ;;  %v3974_v18 = vld [vmem:[#allocation7 + $0x4ac] ss:$28 sps:$4 sm:$0xff]  }
 0x3d1   :  { %2954 = vmatmul.mubr.bf16.vlgmr.msra.gmra.mrb[16].mxu0 %v4331_v36  ;;  %2841 = vmatpush1.bf16.msra.mxu1 %v3957_v43 }
 0x3d2   :  { %2872 = vmatprep.mubr.bf16.mxu1 %v4324_v56  ;;  %2842 = vmatprep.subr.bf16.mxu1 %v3962_v44  ;;  %v3975_v56 = vld [vmem:[#allocation7 + $0x4e0] ss:$28 sps:$4 sm:$0xff]  }
 0x3d5   :  { %2843 = vmatpush1.bf16.msra.mxu1 %v3960_v45 }
 0x3d6   :  { %2844 = vmatprep.subr.bf16.mxu1 %v3965_v46 }
 0x3d9   :  { %2845 = vmatpush1.bf16.msra.mxu1 %v3963_v47 }
 0x3da   :  { %2846 = vmatprep.subr.bf16.mxu1 %v3968_v48 }
 0x3dd   :  { %2847 = vmatpush1.bf16.msra.mxu1 %v3966_v49 }
 0x3de   :  { %2848 = vmatprep.subr.bf16.mxu1 %v3971_v50 }
 0x3e1   :  { %2849 = vmatpush1.bf16.msra.mxu1 %v3969_v15  ;;  %v1474_v15 = vsub.s32 6, %v4261_v9 }
 0x3e2   :  { %2850 = vmatprep.subr.bf16.mxu1 %v3974_v18 }
 0x3e3   :  { %v1475_v18 = vrot.slane %v4346_v14, %v1474_v15 }
 0x3e5   :  { %2851 = vmatpush1.bf16.msra.mxu1 %v3972_v51 }
 0x3e6   :  { %2852 = vmatprep.subr.bf16.mxu1 %v3977_v52 }
 0x3e9   :  { %2853 = vmatpush1.bf16.msra.mxu1 %v3975_v56 }
 0x3ea   :  { %2854 = vmatprep.subr.bf16.mxu1 %v3980_v53 }
 0x3ed   :  { %2855 = vmatpush1.bf16.msra.mxu1 %v3978_v54 }
 0x3ee   :  { %2856 = vmatprep.subr.bf16.mxu1 %v3983_v55 }
 0x3f1   :  { %2857 = vmatpush1.bf16.msra.mxu1 %v3981_v57 }
 0x3f2   :  { %2858 = vmatprep.subr.bf16.mxu1 %v3986_v58 }
 0x3f5   :  { %2859 = vmatpush1.bf16.msra.mxu1 %v3984_v60 }
 0x3f6   :  { %2860 = vmatprep.subr.bf16.mxu1 %v3989_v61 }
 0x3f9   :  { %2861 = vmatpush1.bf16.msra.mxu1 %v3987_v62 }
 0x3fa   :  { %2862 = vmatprep.subr.bf16.mxu1 %v3992_v63 }
 0x3fd   :  { %2863 = vmatpush1.bf16.msra.mxu1 %v3990_v2  ;;  %v1466_v2 = vsub.s32 4, %v4261_v9 }
 0x3fe   :  { %2864 = vmatprep.subr.bf16.mxu1 %v3995_v3  ;;  %v1470_v3 = vsub.s32 5, %v4261_v9 }
 0x401   :  { %2865 = vmatpush1.bf16.msra.mxu1 %v3993_v4  ;;  %v1467_v4 = vrot.slane %v4346_v14, %v1466_v2 }
 0x402   :  { %2866 = vmatprep.subr.bf16.mxu1 %v3998_v5  ;;  %v1471_v5 = vrot.slane %v4346_v14, %v1470_v3 }
 0x405   :  { %2867 = vmatpush1.bf16.msra.mxu1 %v3996_v6 }
 0x406   :  { %2868 = vmatprep.subr.bf16.mxu1 %v4001_v7 }
 0x409   :  { %2869 = vmatpush1.bf16.msra.mxu1 %v3999_v8 }
 0x40a   :  { %2870 = vmatprep.subr.bf16.mxu1 %v4004_v13 }
 0x40d   :  { %2871 = vmatpush1.bf16.msra.mxu1 %v4002_v11 }
 0x410   :  { %2873 = vmatmul.mubr.bf16.vlgmr.msra.gmra.mrb[16].mxu1 %v4331_v36 }
 0x463   :  { %v2710_v21 = vpop.f32.mrb[12].mxu1  ;;  %v2792_v0 = vpop.f32.mrb[8].mxu0 }
 0x464   :  { %v3460_v36 = vadd.f32 %v2710_v21, %v1451_v16  ;;  %v3462_v22 = vadd.f32 %v2792_v0, %v1459_v17  ;;  %v2712_v24 = vpop.f32.mrb[13].mxu1  ;;  %v2794_v25 = vpop.f32.mrb[9].mxu0 }
 0x465   :  { %v3461_v26 = vadd.f32 %v2712_v24, %v1455_v19  ;;  %v3463_v27 = vadd.f32 %v2794_v25, %v1463_v20  ;;  %v2714_v28 = vpop.f32.mrb[14].mxu1  ;;  %v2796_v29 = vpop.f32.mrb[10].mxu0 }
 0x466   :  { %v3399_v10 = vmul.f32 -1.442695, %v3460_v36  ;;  %v3401_v30 = vmul.f32 -1.442695, %v3462_v22  ;;  %v2715_v31 = vpop.f32.mrb[15].mxu1  ;;  %v2797_v59 = vpop.f32.mrb[11].mxu0 }
 0x467   :  { %v3400_v32 = vmul.f32 -1.442695, %v3461_v26  ;;  %v3402_v33 = vmul.f32 -1.442695, %v3463_v27 }
 0x468   :  { %4007 = vpow2.f32 %v3399_v10 }
 0x469   :  { %4009 = vpow2.f32 %v3401_v30 }
 0x46a   :  { %4011 = vpow2.f32 %v3400_v32 }
 0x46b   :  { %4013 = vpow2.f32 %v3402_v33 }
 0x472   :  { %v4008_v12 = vpop.eup %4007 }
 0x473   :  { %v4010_v23 = vpop.eup %4009  ;;  %v2982_v1 = vadd.f32 1.0, %v4008_v12 }
 0x474   :  { %v4012_v34 = vpop.eup %4011  ;;  %v2984_v35 = vadd.f32 1.0, %v4010_v23 }
 0x475   :  { %v4014_v37 = vpop.eup %4013  ;;  %4015 = vrcp.f32 %v2982_v1  ;;  %v2983_v38 = vadd.f32 1.0, %v4012_v34 }
 0x476   :  { %4017 = vrcp.f32 %v2984_v35  ;;  %v2985_v39 = vadd.f32 1.0, %v4014_v37 }
 0x477   :  { %4019 = vrcp.f32 %v2983_v38 }
 0x478   :  { %4021 = vrcp.f32 %v2985_v39 }
 0x47f   :  { %v4016_v40 = vpop.eup %4015 }
 0x480   :  { %v4018_v41 = vpop.eup %4017 }
 0x481   :  { %v4020_v42 = vpop.eup %4019 }
 0x482   :  { %v4022_v43 = vpop.eup %4021  ;;  %v3410_v44 = vpack.c.bf16 %v4020_v42, %v4016_v40 }
 0x483   :  { %v3411_v45 = vpack.c.bf16 %v4022_v43, %v4018_v41 }
 0x484   :  { %3032 = vst [vmem:[%s4384_s10] sm:$0xff] %v3410_v44  ;;  %v3430_v46 = vpop.f32.mrb[12].mxu0 }
 0x485   :  { %3033 = vst [vmem:[%s4384_s10 + $0x8] sm:$0xff] %v3411_v45  ;;  %v3431_v47 = vpop.f32.mrb[13].mxu0 }
 0x486   :  { %v3432_v48 = vadd.f32 %v3431_v47, %v3430_v46  ;;  %v3433_v49 = vpop.f32.mrb[14].mxu0 }
 0x487   :  { %v3434_v50 = vpop.f32.mrb[15].mxu0 }
 0x488   :  { %v2916_v56 = vadd.f32 %v3432_v48, %v1475_v18 }
 0x4a4   :  { %v3452_v51 = vpop.f32.mrb[16].mxu0 }
 0x4a5   :  { %v3453_v52 = vpop.f32.mrb[17].mxu0 }
 0x4a6   :  { %v3454_v53 = vadd.f32 %v3453_v52, %v3452_v51  ;;  %v3455_v54 = vpop.f32.mrb[18].mxu0 }
 0x4a7   :  { %v3456_v55 = vpop.f32.mrb[19].mxu0 }
 0x4a8   :  { %v2956_v57 = vadd.f32 %v3454_v53, %v2916_v56 }
 0x4aa   :  { %v3405_v58 = vmul.f32 -1.442695, %v2956_v57 }
 0x4ac   :  { %4023 = vpow2.f32 %v3405_v58 }
 0x4b6   :  { %v4024_v60 = vpop.eup %4023 }
 0x4b7   :  { %v2988_v61 = vadd.f32 1.0, %v4024_v60 }
 0x4b9   :  { %4025 = vrcp.f32 %v2988_v61 }
 0x4c3   :  { %v4026_v62 = vpop.eup %4025 }
 0x4c4   :  { %v3413_v63 = vpack.c.bf16 %v4026_v62, %v4026_v62 }
 0x4c6   :  { %3035 = vst [vmem:[%s4384_s10 + $0x18] sm:$0xf] %v3413_v63 }
 0x4e3   :  { %v2874_v6 = vpop.f32.mrb[16].mxu1 }
 0x4e4   :  { %v3464_v7 = vadd.f32 %v2874_v6, %v1467_v4  ;;  %v2876_v8 = vpop.f32.mrb[17].mxu1 }
 0x4e5   :  { %v3465_v13 = vadd.f32 %v2876_v8, %v1471_v5  ;;  %v2878_v11 = vpop.f32.mrb[18].mxu1 }
 0x4e6   :  { %v3403_v16 = vmul.f32 -1.442695, %v3464_v7  ;;  %v2879_v17 = vpop.f32.mrb[19].mxu1 }
 0x4e7   :  { %v3404_v19 = vmul.f32 -1.442695, %v3465_v13 }
 0x4e8   :  { %4027 = vpow2.f32 %v3403_v16 }
 0x4e9   :  { %4029 = vpow2.f32 %v3404_v19 }
 0x4f2   :  { %v4028_v20 = vpop.eup %4027 }
 0x4f3   :  { %v4030_v21 = vpop.eup %4029  ;;  %v2986_v0 = vadd.f32 1.0, %v4028_v20 }
 0x4f4   :  { %v2987_v36 = vadd.f32 1.0, %v4030_v21 }
 0x4f5   :  { %4031 = vrcp.f32 %v2986_v0 }
 0x4f6   :  { %4033 = vrcp.f32 %v2987_v36 }
 0x4ff   :  { %v4032_v9 = vpop.eup %4031 }
 0x500   :  { %v4034_v22 = vpop.eup %4033 }
 0x501   :  { %v3412_v24 = vpack.c.bf16 %v4034_v22, %v4032_v9 }
 0x503   :  { %3034 = vst [vmem:[%s4384_s10 + $0x10] sm:$0xff] %v3412_v24 }
 0x504   :  { %3044 = vsyncpa [#allocation3], 1 }
 0x505   :  { %3045 = vsyncpa [#allocation5], 1 }
 0x506   :  { %3046 = vsyncpa [#allocation8], 1 }

</bundles_post_ra>
